<compile_context>
chip_gen: v6e
topology: v6e:2x2x1
jax: 0.10.0
libtpu: 0.0.40
codegen_flags: <defaults>
</compile_context>

<pallas_src>
import numpy as np
import jax
import jax.numpy as jnp
from jax import lax
from jax.experimental import pallas as pl
from jax.experimental.pallas import tpu as pltpu


# ----------------------------------------------------------------------------
# Weight pre-processing helpers (host side, init time only)
# ----------------------------------------------------------------------------
def _place_gates(m, direction, hdim):
    """[X, 4H] (gate cols i,f,g,o) -> [X, 8H] with interleaved gate columns
    [i_f, i_b, f_f, f_b, g_f, g_b, o_f, o_b]; `direction` 0=fwd, 1=bwd."""
    out = jnp.zeros((m.shape[0], 8 * hdim), m.dtype)
    for gi in range(4):
        col = (2 * gi + direction) * hdim
        out = out.at[:, col:col + hdim].set(m[:, gi * hdim:(gi + 1) * hdim])
    return out


# ----------------------------------------------------------------------------
# Fused kernel factory (static config captured by closure)
# ----------------------------------------------------------------------------
def _make_fused_kernel(t_total, bp, hdim, num_layers, vp, code_dim):
    def kernel(*refs):
        if num_layers > 1:
            (idsf_ref, idsb_ref, tab0_ref, bias_ref, whh_ref, wbig_ref,
             wfc_ref, bfc_ref, out_ref, xw_sc, h_sc, c_sc, hid_sc, y2_sc) = refs
        else:
            (idsf_ref, idsb_ref, tab0_ref, bias_ref, whh_ref,
             wfc_ref, bfc_ref, out_ref, xw_sc, h_sc, c_sc, hid_sc) = refs
            wbig_ref = None
            y2_sc = None

        n_rows = t_total * bp

        # ---- Layer-0 hoisted input projection (embedding folded in) --------
        # xw row block s lanes: fwd gate cols use x(s), bwd gate cols use
        # x(T-1-s) (time-reversed ids), bias folded in. One contiguous
        # [Bp, 8H] row block per recurrence step.
        lane_iota = lax.broadcasted_iota(jnp.int32, (n_rows, vp), 1)
        oh_f = (idsf_ref[...] == lane_iota).astype(jnp.float32)
        oh_b = (idsb_ref[...] == lane_iota).astype(jnp.float32)
        xw_sc[...] = (
            jnp.dot(oh_f, tab0_ref[0:vp, :], preferred_element_type=jnp.float32)
            + jnp.dot(oh_b, tab0_ref[vp:2 * vp, :], preferred_element_type=jnp.float32)
            + bias_ref[0:1, :])

        for layer in range(num_layers):
            h_sc[...] = jnp.zeros_like(h_sc)      # [Bp, 2H] = [h_fwd | h_bwd]
            c_sc[...] = jnp.zeros_like(c_sc)
            whh_l = whh_ref[layer * 2 * hdim:(layer + 1) * 2 * hdim, :]  # [2H, 8H]
            write_seq = layer + 1 < num_layers

            def body(s, row, whh_l=whh_l, write_seq=write_seq):
                # Single [Bp,2H]@[2H,8H] gate matmul covers BOTH directions.
                p = xw_sc[pl.ds(row, bp), :] + jnp.dot(
                    h_sc[...], whh_l, preferred_element_type=jnp.float32)
                # Gate columns are interleaved -> contiguous 2H-wide slices;
                # 3 EUP passes for the gates instead of 8.
                sig_if = jax.nn.sigmoid(p[:, 0:4 * hdim])
                i_cat = sig_if[:, 0:2 * hdim]
                f_cat = sig_if[:, 2 * hdim:4 * hdim]
                g_cat = jnp.tanh(p[:, 4 * hdim:6 * hdim])
                o_cat = jax.nn.sigmoid(p[:, 6 * hdim:8 * hdim])
                c_new = f_cat * c_sc[...] + i_cat * g_cat
                h_new = o_cat * jnp.tanh(c_new)
                c_sc[...] = c_new
                h_sc[...] = h_new
                if write_seq:
                    # Only for non-final layers: build the [y(t) | y(T-1-t)]
                    # slab so the next layer's input projection is one GEMM.
                    # s is a static Python int on this path.
                    r0 = s * bp                      # source time s
                    r1 = (t_total - 1 - s) * bp      # source time T-1-s
                    hf = h_new[:, 0:hdim]            # fwd output at time s
                    hb = h_new[:, hdim:2 * hdim]     # bwd output at time T-1-s
                    y2_sc[r0:r0 + bp, 0:hdim] = hf
                    y2_sc[r1:r1 + bp, 2 * hdim:3 * hdim] = hf
                    y2_sc[r1:r1 + bp, hdim:2 * hdim] = hb
                    y2_sc[r0:r0 + bp, 3 * hdim:4 * hdim] = hb

            if write_seq or t_total <= 32:
                # Static unroll: every slice offset is a compile-time constant.
                for s in range(t_total):
                    body(s, s * bp)
            else:
                def fori_body(s, carry):
                    body(s, pl.multiple_of(s * bp, bp))
                    return carry
                lax.fori_loop(0, t_total, fori_body, 0)

            # torch h_n ordering: (layer0 fwd | layer0 bwd | layer1 fwd | ...)
            hid_sc[:, layer * 2 * hdim:(layer + 1) * 2 * hdim] = h_sc[...]

            if write_seq:
                xw_sc[...] = (
                    jnp.dot(y2_sc[...],
                            wbig_ref[layer * 4 * hdim:(layer + 1) * 4 * hdim, :],
                            preferred_element_type=jnp.float32)
                    + bias_ref[layer + 1:layer + 2, :])

        # ---- FC head (mean | softplus(std)) fused as finalize ---------------
        z = (jnp.dot(hid_sc[...], wfc_ref[...], preferred_element_type=jnp.float32)
             + bfc_ref[...])
        lane = lax.broadcasted_iota(jnp.int32, z.shape, 1)
        is_std = lane >= code_dim
        # torch.nn.functional.softplus (beta=1, threshold=20)
        sp = jnp.where(z > 20.0, z, jnp.log1p(jnp.exp(jnp.minimum(z, 20.0))))
        out_ref[...] = jnp.where(is_std, sp, z)

    return kernel


# ----------------------------------------------------------------------------
# StyleEncoder
# ----------------------------------------------------------------------------
class StyleEncoderPallas:
    def __init__(self, embedding_dim, code_dim, num_layers, hidden_dim, pos_list, key):
        # in-script stand-in for data/pos_list.json
        self.pos_voc = {'<pad>': 0}
        self.pos_voc.update({pos: i + 1 for i, pos in enumerate(pos_list)})
        self.embedding_dim = embedding_dim
        self.code_dim = code_dim
        self.num_layers = num_layers
        self.hidden_dim = hidden_dim
        vocab = len(self.pos_voc)
        H = hidden_dim

        keys = iter(jax.random.split(key, 256))

        def unif(shape, scale):
            return jax.random.uniform(next(keys), shape, jnp.float32, -scale, scale)

        # Embedding table, padding_idx=0; vocab padded to a 128-lane multiple.
        emb = unif((vocab, embedding_dim), 1.0).at[0].set(0.0)
        vp = max(128, ((vocab + 127) // 128) * 128)
        self.vp = vp
        self.emb_padded = jnp.zeros((vp, embedding_dim), jnp.float32).at[:vocab].set(emb)

        # Raw (torch-equivalent, transposed) LSTM params -- used by the reference.
        # raw_params[layer] = ((wih_f [Din,4H], whh_f [H,4H], b_f [4H]), (bwd ...))
        k = 1.0 / np.sqrt(H)
        self.raw_params = []
        for layer in range(num_layers):
            din = embedding_dim if layer == 0 else 2 * H
            dirs = []
            for _d in range(2):
                w_ih = unif((4 * H, din), k)            # torch layout
                w_hh = unif((4 * H, H), k)
                b_ih = unif((4 * H,), k)
                b_hh = unif((4 * H,), k)
                dirs.append((jnp.transpose(w_ih), jnp.transpose(w_hh), b_ih + b_hh))
            self.raw_params.append(tuple(dirs))

        # ---- kernel-side parameters: interleaved-gate, direction-fused ------
        tab_rows, whh_rows, bias_rows, wbig_rows = [], [], [], []
        for layer in range(num_layers):
            (wih_f, whh_f, b_f), (wih_b, whh_b, b_b) = self.raw_params[layer]
            if layer == 0:
                # embedding folded into the layer-0 input projection tables
                tab_rows.append(_place_gates(self.emb_padded @ wih_f, 0, H))
                tab_rows.append(_place_gates(self.emb_padded @ wih_b, 1, H))
            else:
                wbig_rows.append(jnp.concatenate(
                    [_place_gates(wih_f, 0, H), _place_gates(wih_b, 1, H)], axis=0))
            whh_rows.append(jnp.concatenate(
                [_place_gates(whh_f, 0, H), _place_gates(whh_b, 1, H)], axis=0))
            bias_rows.append(_place_gates(b_f[None, :], 0, H)[0]
                             + _place_gates(b_b[None, :], 1, H)[0])
        self.tab0 = jnp.concatenate(tab_rows, axis=0)        # [2*Vp, 8H]
        self.whh_stack = jnp.concatenate(whh_rows, axis=0)   # [L*2H, 8H] block-diag
        self.bias_stack = jnp.stack(bias_rows, axis=0)       # [L, 8H]
        self.wbig_stack = (jnp.concatenate(wbig_rows, axis=0)
                           if num_layers > 1 else None)      # [(L-1)*4H, 8H]

        fc_in = H * 2 * num_layers
        kf = 1.0 / np.sqrt(fc_in)
        w_fc = unif((2 * code_dim, fc_in), kf)               # torch layout
        b_fc = unif((2 * code_dim,), kf)
        self.w_fc = jnp.transpose(w_fc)                      # [fc_in, 2*cd] (mean|std)
        self.b_fc = b_fc.reshape(1, 2 * code_dim)

        self.log_scales = jnp.log(jnp.array([3.0, 0.15], jnp.float32))

    @property
    def scales(self):
        return jnp.clip(jnp.exp(self.log_scales), 0.05, 10.0)

    def encode_ids(self, title_pos):
        max_len = max(len(tp) for tp in title_pos)
        ids = [[self.pos_voc[p] for p in tp] + [0] * (max_len - len(tp))
               for tp in title_pos]
        return jnp.asarray(ids, dtype=jnp.int32)

    def _fused_call(self, ids_f, ids_b, t, bp):
        H, L, cd = self.hidden_dim, self.num_layers, self.code_dim
        n = t * bp

        kernel = _make_fused_kernel(t_total=t, bp=bp, hdim=H,
                                    num_layers=L, vp=self.vp, code_dim=cd)

        inputs = [ids_f, ids_b, self.tab0, self.bias_stack, self.whh_stack]
        if L > 1:
            inputs.append(self.wbig_stack)
        inputs += [self.w_fc, self.b_fc]

        scratch = [pltpu.VMEM((n, 8 * H), jnp.float32),        # hoisted projection
                   pltpu.VMEM((bp, 2 * H), jnp.float32),       # h [fwd | bwd]
                   pltpu.VMEM((bp, 2 * H), jnp.float32),       # c
                   pltpu.VMEM((bp, 2 * H * L), jnp.float32)]   # final hidden concat
        if L > 1:
            scratch.append(pltpu.VMEM((n, 4 * H), jnp.float32))  # [y(t) | y(T-1-t)]

        in_elems = sum(int(np.prod(a.shape)) for a in inputs)
        scr_elems = (n * 8 * H + 2 * (bp * 2 * H) + bp * 2 * H * L
                     + (n * 4 * H if L > 1 else 0))
        out_elems = bp * 2 * cd
        # explicit limit so the same design scales on v7x's smaller VMEM
        vmem_limit = int(min(48 * 1024 * 1024,
                             max(16 * 1024 * 1024,
                                 8 * (in_elems + scr_elems + out_elems))))

        return pl.pallas_call(
            kernel,
            out_shape=jax.ShapeDtypeStruct((bp, 2 * cd), jnp.float32),
            in_specs=[pl.BlockSpec(memory_space=pltpu.MemorySpace.VMEM)] * len(inputs),
            out_specs=pl.BlockSpec(memory_space=pltpu.MemorySpace.VMEM),
            scratch_shapes=scratch,
            compiler_params=pltpu.CompilerParams(vmem_limit_bytes=vmem_limit),
        )(*inputs)

    def forward(self, batch_raw):
        ids = self.encode_ids(batch_raw['title_pos'])              # [B, T]
        b, t = ids.shape
        bp = max(8, ((b + 7) // 8) * 8)                            # sublane-dense batch
        ids_p = jnp.zeros((bp, t), jnp.int32).at[:b].set(ids)      # pad rows = <pad>
        ids_f = jnp.transpose(ids_p).reshape(t * bp, 1)            # time-major, fwd order
        ids_b = jnp.transpose(ids_p[:, ::-1]).reshape(t * bp, 1)   # time-reversed order

        out = self._fused_call(ids_f, ids_b, t, bp)                # [Bp, 2*cd]
        mean = out[:b, :self.code_dim]
        std = out[:b, self.code_dim:]
        return mean, std                                           # Normal(mean, std)


# ----------------------------------------------------------------------------
# Pure-JAX reference for correctness checking.
# ----------------------------------------------------------------------------
def reference_forward(enc, batch_raw):
    ids = enc.encode_ids(batch_raw['title_pos'])
    x = jnp.transpose(jnp.take(enc.emb_padded, ids, axis=0), (1, 0, 2))  # [T, B, E]
    hdim = enc.hidden_dim

    def run_dir(x_tbd, wih, whh, b):
        h0 = jnp.zeros((x_tbd.shape[1], hdim), jnp.float32)
        c0 = jnp.zeros_like(h0)

        def step(carry, x_t):
            h, c = carry
            p = x_t @ wih + h @ whh + b
            i = jax.nn.sigmoid(p[:, :hdim])
            f = jax.nn.sigmoid(p[:, hdim:2 * hdim])
            g = jnp.tanh(p[:, 2 * hdim:3 * hdim])
            o = jax.nn.sigmoid(p[:, 3 * hdim:])
            c = f * c + i * g
            h = o * jnp.tanh(c)
            return (h, c), h

        (h_f, _), outs = lax.scan(step, (h0, c0), x_tbd)
        return outs, h_f

    h_feats = []
    for layer in range(enc.num_layers):
        (wih_f, whh_f, b_f), (wih_b, whh_b, b_b) = enc.raw_params[layer]
        out_f, h_f = run_dir(x, wih_f, whh_f, b_f)
        out_b_rev, h_b = run_dir(x[::-1], wih_b, whh_b, b_b)
        h_feats += [h_f, h_b]
        x = jnp.concatenate([out_f, out_b_rev[::-1]], axis=-1)
    hidden = jnp.concatenate(h_feats, axis=-1)
    out = hidden @ enc.w_fc + enc.b_fc
    mean = out[:, :enc.code_dim]
    std = jax.nn.softplus(out[:, enc.code_dim:])
    return mean, std


if __name__ == "__main__":
    # Synthetic stand-in for data/pos_list.json
    pos_list = ["NOUN", "VERB", "ADJ", "ADV", "PRON", "DET",
                "ADP", "NUM", "CONJ", "PRT", ".", "X"]

    batch_raw = {
        "title_pos": [
            ["DET", "ADJ", "NOUN", "VERB", "ADP", "DET", "NOUN", "."],
            ["NOUN", "VERB", "ADV", "ADJ", "NOUN"],          # shorter -> padded
        ]
    }

    # num_layers=1 matches the module's from_checkpoint config; also exercise
    # the multi-layer path (num_layers=2) of the fused kernel.
    for nl in (1, 2):
        enc = StyleEncoderPallas(embedding_dim=32, code_dim=16, num_layers=nl,
                                 hidden_dim=32, pos_list=pos_list,
                                 key=jax.random.PRNGKey(0))
        mean, std = enc.forward(batch_raw)
        jax.block_until_ready((mean, std))

        ref_mean, ref_std = reference_forward(enc, batch_raw)
        assert mean.shape == (2, enc.code_dim) and std.shape == (2, enc.code_dim)
        assert bool(jnp.all(std > 0.0))
        np.testing.assert_allclose(np.asarray(mean), np.asarray(ref_mean),
                                   rtol=1e-3, atol=1e-3)
        np.testing.assert_allclose(np.asarray(std), np.asarray(ref_std),
                                   rtol=1e-3, atol=1e-3)

    print("KERNEL_OK")
</pallas_src>

<mosaic_0001>
module attributes {stable_mosaic.version = 11 : i64} {
  func.func @kernel(%arg0: memref<64x1xi32, #tpu.memory_space<vmem>>, %arg1: memref<64x1xi32, #tpu.memory_space<vmem>>, %arg2: memref<256x256xf32, #tpu.memory_space<vmem>>, %arg3: memref<1x256xf32, #tpu.memory_space<vmem>>, %arg4: memref<64x256xf32, #tpu.memory_space<vmem>>, %arg5: memref<64x32xf32, #tpu.memory_space<vmem>>, %arg6: memref<1x32xf32, #tpu.memory_space<vmem>>, %arg7: memref<8x32xf32, #tpu.memory_space<vmem>>, %arg8: memref<64x256xf32, #tpu.memory_space<vmem>>, %arg9: memref<8x64xf32, #tpu.memory_space<vmem>>, %arg10: memref<8x64xf32, #tpu.memory_space<vmem>>, %arg11: memref<8x64xf32, #tpu.memory_space<vmem>>) attributes {dimension_semantics = [], scalar_prefetch = 0 : i64, scratch_operands = 4 : i64, tpu.core_type = #tpu.core_type<tc>} {
    %0 = tpu.iota {dimensions = array<i32: 1>} : vector<64x128xi32>
    %c0 = arith.constant 0 : index
    %c0_0 = arith.constant 0 : index
    %1 = vector.load %arg0[%c0, %c0_0] : memref<64x1xi32, #tpu.memory_space<vmem>>, vector<64x1xi32>
    %2 = vector.broadcast %1 : vector<64x1xi32> to vector<64x128xi32>
    %3 = arith.cmpi eq, %2, %0 : vector<64x128xi32>
    %4 = arith.extui %3 : vector<64x128xi1> to vector<64x128xi32>
    %5 = arith.sitofp %4 : vector<64x128xi32> to vector<64x128xf32>
    %c0_1 = arith.constant 0 : index
    %c0_2 = arith.constant 0 : index
    %6 = vector.load %arg1[%c0_1, %c0_2] : memref<64x1xi32, #tpu.memory_space<vmem>>, vector<64x1xi32>
    %7 = vector.broadcast %6 : vector<64x1xi32> to vector<64x128xi32>
    %8 = arith.cmpi eq, %7, %0 : vector<64x128xi32>
    %9 = arith.extui %8 : vector<64x128xi1> to vector<64x128xi32>
    %10 = arith.sitofp %9 : vector<64x128xi32> to vector<64x128xf32>
    %c0_3 = arith.constant 0 : index
    %c0_4 = arith.constant 0 : index
    %11 = vector.load %arg2[%c0_3, %c0_4] : memref<256x256xf32, #tpu.memory_space<vmem>>, vector<128x256xf32>
    %cst = arith.constant dense<0.000000e+00> : vector<64x256xf32>
    %12 = tpu.matmul %5, %11, %cst {dimension_numbers = #tpu.dot_dimension_numbers<[1], [0], [0], [1], [0, 0, 1, 1], [], []>} : vector<64x128xf32>, vector<128x256xf32>, vector<64x256xf32> -> vector<64x256xf32>
    %c128 = arith.constant 128 : index
    %c0_5 = arith.constant 0 : index
    %13 = vector.load %arg2[%c128, %c0_5] : memref<256x256xf32, #tpu.memory_space<vmem>>, vector<128x256xf32>
    %cst_6 = arith.constant dense<0.000000e+00> : vector<64x256xf32>
    %14 = tpu.matmul %10, %13, %cst_6 {dimension_numbers = #tpu.dot_dimension_numbers<[1], [0], [0], [1], [0, 0, 1, 1], [], []>} : vector<64x128xf32>, vector<128x256xf32>, vector<64x256xf32> -> vector<64x256xf32>
    %15 = arith.addf %12, %14 : vector<64x256xf32>
    %c0_7 = arith.constant 0 : index
    %c0_8 = arith.constant 0 : index
    %16 = vector.load %arg3[%c0_7, %c0_8] : memref<1x256xf32, #tpu.memory_space<vmem>>, vector<1x256xf32>
    %17 = vector.broadcast %16 : vector<1x256xf32> to vector<64x256xf32>
    %18 = arith.addf %15, %17 : vector<64x256xf32>
    %c0_9 = arith.constant 0 : index
    %c0_10 = arith.constant 0 : index
    %19 = vector.load %arg8[%c0_9, %c0_10] : memref<64x256xf32, #tpu.memory_space<vmem>>, vector<64x256xf32>
    tpu.vector_store %arg8[%c0_9, %c0_10], %18 {strides = array<i32>} : memref<64x256xf32, #tpu.memory_space<vmem>>, vector<64x256xf32>,
    %cst_11 = arith.constant 0.000000e+00 : f32
    %20 = vector.broadcast %cst_11 : f32 to vector<8x64xf32>
    %c0_12 = arith.constant 0 : index
    %c0_13 = arith.constant 0 : index
    %21 = vector.load %arg9[%c0_12, %c0_13] : memref<8x64xf32, #tpu.memory_space<vmem>>, vector<8x64xf32>
    tpu.vector_store %arg9[%c0_12, %c0_13], %20 {strides = array<i32>} : memref<8x64xf32, #tpu.memory_space<vmem>>, vector<8x64xf32>,
    %cst_14 = arith.constant 0.000000e+00 : f32
    %22 = vector.broadcast %cst_14 : f32 to vector<8x64xf32>
    %c0_15 = arith.constant 0 : index
    %c0_16 = arith.constant 0 : index
    %23 = vector.load %arg10[%c0_15, %c0_16] : memref<8x64xf32, #tpu.memory_space<vmem>>, vector<8x64xf32>
    tpu.vector_store %arg10[%c0_15, %c0_16], %22 {strides = array<i32>} : memref<8x64xf32, #tpu.memory_space<vmem>>, vector<8x64xf32>,
    %c0_17 = arith.constant 0 : index
    %c0_18 = arith.constant 0 : index
    %24 = vector.load %arg4[%c0_17, %c0_18] : memref<64x256xf32, #tpu.memory_space<vmem>>, vector<64x256xf32>
    %c0_19 = arith.constant 0 : index
    %c0_20 = arith.constant 0 : index
    %25 = vector.load %arg8[%c0_19, %c0_20] : memref<64x256xf32, #tpu.memory_space<vmem>>, vector<8x256xf32>
    %c0_21 = arith.constant 0 : index
    %c0_22 = arith.constant 0 : index
    %26 = vector.load %arg9[%c0_21, %c0_22] : memref<8x64xf32, #tpu.memory_space<vmem>>, vector<8x64xf32>
    %cst_23 = arith.constant dense<0.000000e+00> : vector<8x256xf32>
    %27 = tpu.matmul %26, %24, %cst_23 {dimension_numbers = #tpu.dot_dimension_numbers<[1], [0], [0], [1], [0, 0, 1, 1], [], []>} : vector<8x64xf32>, vector<64x256xf32>, vector<8x256xf32> -> vector<8x256xf32>
    %28 = arith.addf %25, %27 : vector<8x256xf32>
    %29 = vector.extract_strided_slice %28 {offsets = [0, 0], sizes = [8, 128], strides = [1, 1]} : vector<8x256xf32> to vector<8x128xf32>
    %30 = arith.negf %29 : vector<8x128xf32>
    %31 = math.exp %30 : vector<8x128xf32>
    %cst_24 = arith.constant 1.000000e+00 : f32
    %32 = vector.broadcast %cst_24 : f32 to vector<8x128xf32>
    %33 = arith.addf %32, %31 : vector<8x128xf32>
    %34 = arith.divf %32, %33 : vector<8x128xf32>
    %35 = vector.extract_strided_slice %34 {offsets = [0, 0], sizes = [8, 64], strides = [1, 1]} : vector<8x128xf32> to vector<8x64xf32>
    %36 = vector.extract_strided_slice %34 {offsets = [0, 64], sizes = [8, 64], strides = [1, 1]} : vector<8x128xf32> to vector<8x64xf32>
    %37 = vector.extract_strided_slice %28 {offsets = [0, 128], sizes = [8, 64], strides = [1, 1]} : vector<8x256xf32> to vector<8x64xf32>
    %38 = math.tanh %37 : vector<8x64xf32>
    %39 = vector.extract_strided_slice %28 {offsets = [0, 192], sizes = [8, 64], strides = [1, 1]} : vector<8x256xf32> to vector<8x64xf32>
    %40 = arith.negf %39 : vector<8x64xf32>
    %41 = math.exp %40 : vector<8x64xf32>
    %cst_25 = arith.constant 1.000000e+00 : f32
    %42 = vector.broadcast %cst_25 : f32 to vector<8x64xf32>
    %43 = arith.addf %42, %41 : vector<8x64xf32>
    %44 = arith.divf %42, %43 : vector<8x64xf32>
    %c0_26 = arith.constant 0 : index
    %c0_27 = arith.constant 0 : index
    %45 = vector.load %arg10[%c0_26, %c0_27] : memref<8x64xf32, #tpu.memory_space<vmem>>, vector<8x64xf32>
    %46 = arith.mulf %36, %45 : vector<8x64xf32>
    %47 = arith.mulf %35, %38 : vector<8x64xf32>
    %48 = arith.addf %46, %47 : vector<8x64xf32>
    %49 = math.tanh %48 : vector<8x64xf32>
    %50 = arith.mulf %44, %49 : vector<8x64xf32>
    %c0_28 = arith.constant 0 : index
    %c0_29 = arith.constant 0 : index
    %51 = vector.load %arg10[%c0_28, %c0_29] : memref<8x64xf32, #tpu.memory_space<vmem>>, vector<8x64xf32>
    tpu.vector_store %arg10[%c0_28, %c0_29], %48 {strides = array<i32>} : memref<8x64xf32, #tpu.memory_space<vmem>>, vector<8x64xf32>,
    %c0_30 = arith.constant 0 : index
    %c0_31 = arith.constant 0 : index
    %52 = vector.load %arg9[%c0_30, %c0_31] : memref<8x64xf32, #tpu.memory_space<vmem>>, vector<8x64xf32>
    tpu.vector_store %arg9[%c0_30, %c0_31], %50 {strides = array<i32>} : memref<8x64xf32, #tpu.memory_space<vmem>>, vector<8x64xf32>,
    %c8 = arith.constant 8 : index
    %c0_32 = arith.constant 0 : index
    %53 = vector.load %arg8[%c8, %c0_32] : memref<64x256xf32, #tpu.memory_space<vmem>>, vector<8x256xf32>
    %c0_33 = arith.constant 0 : index
    %c0_34 = arith.constant 0 : index
    %54 = vector.load %arg9[%c0_33, %c0_34] : memref<8x64xf32, #tpu.memory_space<vmem>>, vector<8x64xf32>
    %cst_35 = arith.constant dense<0.000000e+00> : vector<8x256xf32>
    %55 = tpu.matmul %54, %24, %cst_35 {dimension_numbers = #tpu.dot_dimension_numbers<[1], [0], [0], [1], [0, 0, 1, 1], [], []>} : vector<8x64xf32>, vector<64x256xf32>, vector<8x256xf32> -> vector<8x256xf32>
    %56 = arith.addf %53, %55 : vector<8x256xf32>
    %57 = vector.extract_strided_slice %56 {offsets = [0, 0], sizes = [8, 128], strides = [1, 1]} : vector<8x256xf32> to vector<8x128xf32>
    %58 = arith.negf %57 : vector<8x128xf32>
    %59 = math.exp %58 : vector<8x128xf32>
    %cst_36 = arith.constant 1.000000e+00 : f32
    %60 = vector.broadcast %cst_36 : f32 to vector<8x128xf32>
    %61 = arith.addf %60, %59 : vector<8x128xf32>
    %62 = arith.divf %60, %61 : vector<8x128xf32>
    %63 = vector.extract_strided_slice %62 {offsets = [0, 0], sizes = [8, 64], strides = [1, 1]} : vector<8x128xf32> to vector<8x64xf32>
    %64 = vector.extract_strided_slice %62 {offsets = [0, 64], sizes = [8, 64], strides = [1, 1]} : vector<8x128xf32> to vector<8x64xf32>
    %65 = vector.extract_strided_slice %56 {offsets = [0, 128], sizes = [8, 64], strides = [1, 1]} : vector<8x256xf32> to vector<8x64xf32>
    %66 = math.tanh %65 : vector<8x64xf32>
    %67 = vector.extract_strided_slice %56 {offsets = [0, 192], sizes = [8, 64], strides = [1, 1]} : vector<8x256xf32> to vector<8x64xf32>
    %68 = arith.negf %67 : vector<8x64xf32>
    %69 = math.exp %68 : vector<8x64xf32>
    %cst_37 = arith.constant 1.000000e+00 : f32
    %70 = vector.broadcast %cst_37 : f32 to vector<8x64xf32>
    %71 = arith.addf %70, %69 : vector<8x64xf32>
    %72 = arith.divf %70, %71 : vector<8x64xf32>
    %c0_38 = arith.constant 0 : index
    %c0_39 = arith.constant 0 : index
    %73 = vector.load %arg10[%c0_38, %c0_39] : memref<8x64xf32, #tpu.memory_space<vmem>>, vector<8x64xf32>
    %74 = arith.mulf %64, %73 : vector<8x64xf32>
    %75 = arith.mulf %63, %66 : vector<8x64xf32>
    %76 = arith.addf %74, %75 : vector<8x64xf32>
    %77 = math.tanh %76 : vector<8x64xf32>
    %78 = arith.mulf %72, %77 : vector<8x64xf32>
    %c0_40 = arith.constant 0 : index
    %c0_41 = arith.constant 0 : index
    %79 = vector.load %arg10[%c0_40, %c0_41] : memref<8x64xf32, #tpu.memory_space<vmem>>, vector<8x64xf32>
    tpu.vector_store %arg10[%c0_40, %c0_41], %76 {strides = array<i32>} : memref<8x64xf32, #tpu.memory_space<vmem>>, vector<8x64xf32>,
    %c0_42 = arith.constant 0 : index
    %c0_43 = arith.constant 0 : index
    %80 = vector.load %arg9[%c0_42, %c0_43] : memref<8x64xf32, #tpu.memory_space<vmem>>, vector<8x64xf32>
    tpu.vector_store %arg9[%c0_42, %c0_43], %78 {strides = array<i32>} : memref<8x64xf32, #tpu.memory_space<vmem>>, vector<8x64xf32>,
    %c16 = arith.constant 16 : index
    %c0_44 = arith.constant 0 : index
    %81 = vector.load %arg8[%c16, %c0_44] : memref<64x256xf32, #tpu.memory_space<vmem>>, vector<8x256xf32>
    %c0_45 = arith.constant 0 : index
    %c0_46 = arith.constant 0 : index
    %82 = vector.load %arg9[%c0_45, %c0_46] : memref<8x64xf32, #tpu.memory_space<vmem>>, vector<8x64xf32>
    %cst_47 = arith.constant dense<0.000000e+00> : vector<8x256xf32>
    %83 = tpu.matmul %82, %24, %cst_47 {dimension_numbers = #tpu.dot_dimension_numbers<[1], [0], [0], [1], [0, 0, 1, 1], [], []>} : vector<8x64xf32>, vector<64x256xf32>, vector<8x256xf32> -> vector<8x256xf32>
    %84 = arith.addf %81, %83 : vector<8x256xf32>
    %85 = vector.extract_strided_slice %84 {offsets = [0, 0], sizes = [8, 128], strides = [1, 1]} : vector<8x256xf32> to vector<8x128xf32>
    %86 = arith.negf %85 : vector<8x128xf32>
    %87 = math.exp %86 : vector<8x128xf32>
    %cst_48 = arith.constant 1.000000e+00 : f32
    %88 = vector.broadcast %cst_48 : f32 to vector<8x128xf32>
    %89 = arith.addf %88, %87 : vector<8x128xf32>
    %90 = arith.divf %88, %89 : vector<8x128xf32>
    %91 = vector.extract_strided_slice %90 {offsets = [0, 0], sizes = [8, 64], strides = [1, 1]} : vector<8x128xf32> to vector<8x64xf32>
    %92 = vector.extract_strided_slice %90 {offsets = [0, 64], sizes = [8, 64], strides = [1, 1]} : vector<8x128xf32> to vector<8x64xf32>
    %93 = vector.extract_strided_slice %84 {offsets = [0, 128], sizes = [8, 64], strides = [1, 1]} : vector<8x256xf32> to vector<8x64xf32>
    %94 = math.tanh %93 : vector<8x64xf32>
    %95 = vector.extract_strided_slice %84 {offsets = [0, 192], sizes = [8, 64], strides = [1, 1]} : vector<8x256xf32> to vector<8x64xf32>
    %96 = arith.negf %95 : vector<8x64xf32>
    %97 = math.exp %96 : vector<8x64xf32>
    %cst_49 = arith.constant 1.000000e+00 : f32
    %98 = vector.broadcast %cst_49 : f32 to vector<8x64xf32>
    %99 = arith.addf %98, %97 : vector<8x64xf32>
    %100 = arith.divf %98, %99 : vector<8x64xf32>
    %c0_50 = arith.constant 0 : index
    %c0_51 = arith.constant 0 : index
    %101 = vector.load %arg10[%c0_50, %c0_51] : memref<8x64xf32, #tpu.memory_space<vmem>>, vector<8x64xf32>
    %102 = arith.mulf %92, %101 : vector<8x64xf32>
    %103 = arith.mulf %91, %94 : vector<8x64xf32>
    %104 = arith.addf %102, %103 : vector<8x64xf32>
    %105 = math.tanh %104 : vector<8x64xf32>
    %106 = arith.mulf %100, %105 : vector<8x64xf32>
    %c0_52 = arith.constant 0 : index
    %c0_53 = arith.constant 0 : index
    %107 = vector.load %arg10[%c0_52, %c0_53] : memref<8x64xf32, #tpu.memory_space<vmem>>, vector<8x64xf32>
    tpu.vector_store %arg10[%c0_52, %c0_53], %104 {strides = array<i32>} : memref<8x64xf32, #tpu.memory_space<vmem>>, vector<8x64xf32>,
    %c0_54 = arith.constant 0 : index
    %c0_55 = arith.constant 0 : index
    %108 = vector.load %arg9[%c0_54, %c0_55] : memref<8x64xf32, #tpu.memory_space<vmem>>, vector<8x64xf32>
    tpu.vector_store %arg9[%c0_54, %c0_55], %106 {strides = array<i32>} : memref<8x64xf32, #tpu.memory_space<vmem>>, vector<8x64xf32>,
    %c24 = arith.constant 24 : index
    %c0_56 = arith.constant 0 : index
    %109 = vector.load %arg8[%c24, %c0_56] : memref<64x256xf32, #tpu.memory_space<vmem>>, vector<8x256xf32>
    %c0_57 = arith.constant 0 : index
    %c0_58 = arith.constant 0 : index
    %110 = vector.load %arg9[%c0_57, %c0_58] : memref<8x64xf32, #tpu.memory_space<vmem>>, vector<8x64xf32>
    %cst_59 = arith.constant dense<0.000000e+00> : vector<8x256xf32>
    %111 = tpu.matmul %110, %24, %cst_59 {dimension_numbers = #tpu.dot_dimension_numbers<[1], [0], [0], [1], [0, 0, 1, 1], [], []>} : vector<8x64xf32>, vector<64x256xf32>, vector<8x256xf32> -> vector<8x256xf32>
    %112 = arith.addf %109, %111 : vector<8x256xf32>
    %113 = vector.extract_strided_slice %112 {offsets = [0, 0], sizes = [8, 128], strides = [1, 1]} : vector<8x256xf32> to vector<8x128xf32>
    %114 = arith.negf %113 : vector<8x128xf32>
    %115 = math.exp %114 : vector<8x128xf32>
    %cst_60 = arith.constant 1.000000e+00 : f32
    %116 = vector.broadcast %cst_60 : f32 to vector<8x128xf32>
    %117 = arith.addf %116, %115 : vector<8x128xf32>
    %118 = arith.divf %116, %117 : vector<8x128xf32>
    %119 = vector.extract_strided_slice %118 {offsets = [0, 0], sizes = [8, 64], strides = [1, 1]} : vector<8x128xf32> to vector<8x64xf32>
    %120 = vector.extract_strided_slice %118 {offsets = [0, 64], sizes = [8, 64], strides = [1, 1]} : vector<8x128xf32> to vector<8x64xf32>
    %121 = vector.extract_strided_slice %112 {offsets = [0, 128], sizes = [8, 64], strides = [1, 1]} : vector<8x256xf32> to vector<8x64xf32>
    %122 = math.tanh %121 : vector<8x64xf32>
    %123 = vector.extract_strided_slice %112 {offsets = [0, 192], sizes = [8, 64], strides = [1, 1]} : vector<8x256xf32> to vector<8x64xf32>
    %124 = arith.negf %123 : vector<8x64xf32>
    %125 = math.exp %124 : vector<8x64xf32>
    %cst_61 = arith.constant 1.000000e+00 : f32
    %126 = vector.broadcast %cst_61 : f32 to vector<8x64xf32>
    %127 = arith.addf %126, %125 : vector<8x64xf32>
    %128 = arith.divf %126, %127 : vector<8x64xf32>
    %c0_62 = arith.constant 0 : index
    %c0_63 = arith.constant 0 : index
    %129 = vector.load %arg10[%c0_62, %c0_63] : memref<8x64xf32, #tpu.memory_space<vmem>>, vector<8x64xf32>
    %130 = arith.mulf %120, %129 : vector<8x64xf32>
    %131 = arith.mulf %119, %122 : vector<8x64xf32>
    %132 = arith.addf %130, %131 : vector<8x64xf32>
    %133 = math.tanh %132 : vector<8x64xf32>
    %134 = arith.mulf %128, %133 : vector<8x64xf32>
    %c0_64 = arith.constant 0 : index
    %c0_65 = arith.constant 0 : index
    %135 = vector.load %arg10[%c0_64, %c0_65] : memref<8x64xf32, #tpu.memory_space<vmem>>, vector<8x64xf32>
    tpu.vector_store %arg10[%c0_64, %c0_65], %132 {strides = array<i32>} : memref<8x64xf32, #tpu.memory_space<vmem>>, vector<8x64xf32>,
    %c0_66 = arith.constant 0 : index
    %c0_67 = arith.constant 0 : index
    %136 = vector.load %arg9[%c0_66, %c0_67] : memref<8x64xf32, #tpu.memory_space<vmem>>, vector<8x64xf32>
    tpu.vector_store %arg9[%c0_66, %c0_67], %134 {strides = array<i32>} : memref<8x64xf32, #tpu.memory_space<vmem>>, vector<8x64xf32>,
    %c32 = arith.constant 32 : index
    %c0_68 = arith.constant 0 : index
    %137 = vector.load %arg8[%c32, %c0_68] : memref<64x256xf32, #tpu.memory_space<vmem>>, vector<8x256xf32>
    %c0_69 = arith.constant 0 : index
    %c0_70 = arith.constant 0 : index
    %138 = vector.load %arg9[%c0_69, %c0_70] : memref<8x64xf32, #tpu.memory_space<vmem>>, vector<8x64xf32>
    %cst_71 = arith.constant dense<0.000000e+00> : vector<8x256xf32>
    %139 = tpu.matmul %138, %24, %cst_71 {dimension_numbers = #tpu.dot_dimension_numbers<[1], [0], [0], [1], [0, 0, 1, 1], [], []>} : vector<8x64xf32>, vector<64x256xf32>, vector<8x256xf32> -> vector<8x256xf32>
    %140 = arith.addf %137, %139 : vector<8x256xf32>
    %141 = vector.extract_strided_slice %140 {offsets = [0, 0], sizes = [8, 128], strides = [1, 1]} : vector<8x256xf32> to vector<8x128xf32>
    %142 = arith.negf %141 : vector<8x128xf32>
    %143 = math.exp %142 : vector<8x128xf32>
    %cst_72 = arith.constant 1.000000e+00 : f32
    %144 = vector.broadcast %cst_72 : f32 to vector<8x128xf32>
    %145 = arith.addf %144, %143 : vector<8x128xf32>
    %146 = arith.divf %144, %145 : vector<8x128xf32>
    %147 = vector.extract_strided_slice %146 {offsets = [0, 0], sizes = [8, 64], strides = [1, 1]} : vector<8x128xf32> to vector<8x64xf32>
    %148 = vector.extract_strided_slice %146 {offsets = [0, 64], sizes = [8, 64], strides = [1, 1]} : vector<8x128xf32> to vector<8x64xf32>
    %149 = vector.extract_strided_slice %140 {offsets = [0, 128], sizes = [8, 64], strides = [1, 1]} : vector<8x256xf32> to vector<8x64xf32>
    %150 = math.tanh %149 : vector<8x64xf32>
    %151 = vector.extract_strided_slice %140 {offsets = [0, 192], sizes = [8, 64], strides = [1, 1]} : vector<8x256xf32> to vector<8x64xf32>
    %152 = arith.negf %151 : vector<8x64xf32>
    %153 = math.exp %152 : vector<8x64xf32>
    %cst_73 = arith.constant 1.000000e+00 : f32
    %154 = vector.broadcast %cst_73 : f32 to vector<8x64xf32>
    %155 = arith.addf %154, %153 : vector<8x64xf32>
    %156 = arith.divf %154, %155 : vector<8x64xf32>
    %c0_74 = arith.constant 0 : index
    %c0_75 = arith.constant 0 : index
    %157 = vector.load %arg10[%c0_74, %c0_75] : memref<8x64xf32, #tpu.memory_space<vmem>>, vector<8x64xf32>
    %158 = arith.mulf %148, %157 : vector<8x64xf32>
    %159 = arith.mulf %147, %150 : vector<8x64xf32>
    %160 = arith.addf %158, %159 : vector<8x64xf32>
    %161 = math.tanh %160 : vector<8x64xf32>
    %162 = arith.mulf %156, %161 : vector<8x64xf32>
    %c0_76 = arith.constant 0 : index
    %c0_77 = arith.constant 0 : index
    %163 = vector.load %arg10[%c0_76, %c0_77] : memref<8x64xf32, #tpu.memory_space<vmem>>, vector<8x64xf32>
    tpu.vector_store %arg10[%c0_76, %c0_77], %160 {strides = array<i32>} : memref<8x64xf32, #tpu.memory_space<vmem>>, vector<8x64xf32>,
    %c0_78 = arith.constant 0 : index
    %c0_79 = arith.constant 0 : index
    %164 = vector.load %arg9[%c0_78, %c0_79] : memref<8x64xf32, #tpu.memory_space<vmem>>, vector<8x64xf32>
    tpu.vector_store %arg9[%c0_78, %c0_79], %162 {strides = array<i32>} : memref<8x64xf32, #tpu.memory_space<vmem>>, vector<8x64xf32>,
    %c40 = arith.constant 40 : index
    %c0_80 = arith.constant 0 : index
    %165 = vector.load %arg8[%c40, %c0_80] : memref<64x256xf32, #tpu.memory_space<vmem>>, vector<8x256xf32>
    %c0_81 = arith.constant 0 : index
    %c0_82 = arith.constant 0 : index
    %166 = vector.load %arg9[%c0_81, %c0_82] : memref<8x64xf32, #tpu.memory_space<vmem>>, vector<8x64xf32>
    %cst_83 = arith.constant dense<0.000000e+00> : vector<8x256xf32>
    %167 = tpu.matmul %166, %24, %cst_83 {dimension_numbers = #tpu.dot_dimension_numbers<[1], [0], [0], [1], [0, 0, 1, 1], [], []>} : vector<8x64xf32>, vector<64x256xf32>, vector<8x256xf32> -> vector<8x256xf32>
    %168 = arith.addf %165, %167 : vector<8x256xf32>
    %169 = vector.extract_strided_slice %168 {offsets = [0, 0], sizes = [8, 128], strides = [1, 1]} : vector<8x256xf32> to vector<8x128xf32>
    %170 = arith.negf %169 : vector<8x128xf32>
    %171 = math.exp %170 : vector<8x128xf32>
    %cst_84 = arith.constant 1.000000e+00 : f32
    %172 = vector.broadcast %cst_84 : f32 to vector<8x128xf32>
    %173 = arith.addf %172, %171 : vector<8x128xf32>
    %174 = arith.divf %172, %173 : vector<8x128xf32>
    %175 = vector.extract_strided_slice %174 {offsets = [0, 0], sizes = [8, 64], strides = [1, 1]} : vector<8x128xf32> to vector<8x64xf32>
    %176 = vector.extract_strided_slice %174 {offsets = [0, 64], sizes = [8, 64], strides = [1, 1]} : vector<8x128xf32> to vector<8x64xf32>
    %177 = vector.extract_strided_slice %168 {offsets = [0, 128], sizes = [8, 64], strides = [1, 1]} : vector<8x256xf32> to vector<8x64xf32>
    %178 = math.tanh %177 : vector<8x64xf32>
    %179 = vector.extract_strided_slice %168 {offsets = [0, 192], sizes = [8, 64], strides = [1, 1]} : vector<8x256xf32> to vector<8x64xf32>
    %180 = arith.negf %179 : vector<8x64xf32>
    %181 = math.exp %180 : vector<8x64xf32>
    %cst_85 = arith.constant 1.000000e+00 : f32
    %182 = vector.broadcast %cst_85 : f32 to vector<8x64xf32>
    %183 = arith.addf %182, %181 : vector<8x64xf32>
    %184 = arith.divf %182, %183 : vector<8x64xf32>
    %c0_86 = arith.constant 0 : index
    %c0_87 = arith.constant 0 : index
    %185 = vector.load %arg10[%c0_86, %c0_87] : memref<8x64xf32, #tpu.memory_space<vmem>>, vector<8x64xf32>
    %186 = arith.mulf %176, %185 : vector<8x64xf32>
    %187 = arith.mulf %175, %178 : vector<8x64xf32>
    %188 = arith.addf %186, %187 : vector<8x64xf32>
    %189 = math.tanh %188 : vector<8x64xf32>
    %190 = arith.mulf %184, %189 : vector<8x64xf32>
    %c0_88 = arith.constant 0 : index
    %c0_89 = arith.constant 0 : index
    %191 = vector.load %arg10[%c0_88, %c0_89] : memref<8x64xf32, #tpu.memory_space<vmem>>, vector<8x64xf32>
    tpu.vector_store %arg10[%c0_88, %c0_89], %188 {strides = array<i32>} : memref<8x64xf32, #tpu.memory_space<vmem>>, vector<8x64xf32>,
    %c0_90 = arith.constant 0 : index
    %c0_91 = arith.constant 0 : index
    %192 = vector.load %arg9[%c0_90, %c0_91] : memref<8x64xf32, #tpu.memory_space<vmem>>, vector<8x64xf32>
    tpu.vector_store %arg9[%c0_90, %c0_91], %190 {strides = array<i32>} : memref<8x64xf32, #tpu.memory_space<vmem>>, vector<8x64xf32>,
    %c48 = arith.constant 48 : index
    %c0_92 = arith.constant 0 : index
    %193 = vector.load %arg8[%c48, %c0_92] : memref<64x256xf32, #tpu.memory_space<vmem>>, vector<8x256xf32>
    %c0_93 = arith.constant 0 : index
    %c0_94 = arith.constant 0 : index
    %194 = vector.load %arg9[%c0_93, %c0_94] : memref<8x64xf32, #tpu.memory_space<vmem>>, vector<8x64xf32>
    %cst_95 = arith.constant dense<0.000000e+00> : vector<8x256xf32>
    %195 = tpu.matmul %194, %24, %cst_95 {dimension_numbers = #tpu.dot_dimension_numbers<[1], [0], [0], [1], [0, 0, 1, 1], [], []>} : vector<8x64xf32>, vector<64x256xf32>, vector<8x256xf32> -> vector<8x256xf32>
    %196 = arith.addf %193, %195 : vector<8x256xf32>
    %197 = vector.extract_strided_slice %196 {offsets = [0, 0], sizes = [8, 128], strides = [1, 1]} : vector<8x256xf32> to vector<8x128xf32>
    %198 = arith.negf %197 : vector<8x128xf32>
    %199 = math.exp %198 : vector<8x128xf32>
    %cst_96 = arith.constant 1.000000e+00 : f32
    %200 = vector.broadcast %cst_96 : f32 to vector<8x128xf32>
    %201 = arith.addf %200, %199 : vector<8x128xf32>
    %202 = arith.divf %200, %201 : vector<8x128xf32>
    %203 = vector.extract_strided_slice %202 {offsets = [0, 0], sizes = [8, 64], strides = [1, 1]} : vector<8x128xf32> to vector<8x64xf32>
    %204 = vector.extract_strided_slice %202 {offsets = [0, 64], sizes = [8, 64], strides = [1, 1]} : vector<8x128xf32> to vector<8x64xf32>
    %205 = vector.extract_strided_slice %196 {offsets = [0, 128], sizes = [8, 64], strides = [1, 1]} : vector<8x256xf32> to vector<8x64xf32>
    %206 = math.tanh %205 : vector<8x64xf32>
    %207 = vector.extract_strided_slice %196 {offsets = [0, 192], sizes = [8, 64], strides = [1, 1]} : vector<8x256xf32> to vector<8x64xf32>
    %208 = arith.negf %207 : vector<8x64xf32>
    %209 = math.exp %208 : vector<8x64xf32>
    %cst_97 = arith.constant 1.000000e+00 : f32
    %210 = vector.broadcast %cst_97 : f32 to vector<8x64xf32>
    %211 = arith.addf %210, %209 : vector<8x64xf32>
    %212 = arith.divf %210, %211 : vector<8x64xf32>
    %c0_98 = arith.constant 0 : index
    %c0_99 = arith.constant 0 : index
    %213 = vector.load %arg10[%c0_98, %c0_99] : memref<8x64xf32, #tpu.memory_space<vmem>>, vector<8x64xf32>
    %214 = arith.mulf %204, %213 : vector<8x64xf32>
    %215 = arith.mulf %203, %206 : vector<8x64xf32>
    %216 = arith.addf %214, %215 : vector<8x64xf32>
    %217 = math.tanh %216 : vector<8x64xf32>
    %218 = arith.mulf %212, %217 : vector<8x64xf32>
    %c0_100 = arith.constant 0 : index
    %c0_101 = arith.constant 0 : index
    %219 = vector.load %arg10[%c0_100, %c0_101] : memref<8x64xf32, #tpu.memory_space<vmem>>, vector<8x64xf32>
    tpu.vector_store %arg10[%c0_100, %c0_101], %216 {strides = array<i32>} : memref<8x64xf32, #tpu.memory_space<vmem>>, vector<8x64xf32>,
    %c0_102 = arith.constant 0 : index
    %c0_103 = arith.constant 0 : index
    %220 = vector.load %arg9[%c0_102, %c0_103] : memref<8x64xf32, #tpu.memory_space<vmem>>, vector<8x64xf32>
    tpu.vector_store %arg9[%c0_102, %c0_103], %218 {strides = array<i32>} : memref<8x64xf32, #tpu.memory_space<vmem>>, vector<8x64xf32>,
    %c56 = arith.constant 56 : index
    %c0_104 = arith.constant 0 : index
    %221 = vector.load %arg8[%c56, %c0_104] : memref<64x256xf32, #tpu.memory_space<vmem>>, vector<8x256xf32>
    %c0_105 = arith.constant 0 : index
    %c0_106 = arith.constant 0 : index
    %222 = vector.load %arg9[%c0_105, %c0_106] : memref<8x64xf32, #tpu.memory_space<vmem>>, vector<8x64xf32>
    %cst_107 = arith.constant dense<0.000000e+00> : vector<8x256xf32>
    %223 = tpu.matmul %222, %24, %cst_107 {dimension_numbers = #tpu.dot_dimension_numbers<[1], [0], [0], [1], [0, 0, 1, 1], [], []>} : vector<8x64xf32>, vector<64x256xf32>, vector<8x256xf32> -> vector<8x256xf32>
    %224 = arith.addf %221, %223 : vector<8x256xf32>
    %225 = vector.extract_strided_slice %224 {offsets = [0, 0], sizes = [8, 128], strides = [1, 1]} : vector<8x256xf32> to vector<8x128xf32>
    %226 = arith.negf %225 : vector<8x128xf32>
    %227 = math.exp %226 : vector<8x128xf32>
    %cst_108 = arith.constant 1.000000e+00 : f32
    %228 = vector.broadcast %cst_108 : f32 to vector<8x128xf32>
    %229 = arith.addf %228, %227 : vector<8x128xf32>
    %230 = arith.divf %228, %229 : vector<8x128xf32>
    %231 = vector.extract_strided_slice %230 {offsets = [0, 0], sizes = [8, 64], strides = [1, 1]} : vector<8x128xf32> to vector<8x64xf32>
    %232 = vector.extract_strided_slice %230 {offsets = [0, 64], sizes = [8, 64], strides = [1, 1]} : vector<8x128xf32> to vector<8x64xf32>
    %233 = vector.extract_strided_slice %224 {offsets = [0, 128], sizes = [8, 64], strides = [1, 1]} : vector<8x256xf32> to vector<8x64xf32>
    %234 = math.tanh %233 : vector<8x64xf32>
    %235 = vector.extract_strided_slice %224 {offsets = [0, 192], sizes = [8, 64], strides = [1, 1]} : vector<8x256xf32> to vector<8x64xf32>
    %236 = arith.negf %235 : vector<8x64xf32>
    %237 = math.exp %236 : vector<8x64xf32>
    %cst_109 = arith.constant 1.000000e+00 : f32
    %238 = vector.broadcast %cst_109 : f32 to vector<8x64xf32>
    %239 = arith.addf %238, %237 : vector<8x64xf32>
    %240 = arith.divf %238, %239 : vector<8x64xf32>
    %c0_110 = arith.constant 0 : index
    %c0_111 = arith.constant 0 : index
    %241 = vector.load %arg10[%c0_110, %c0_111] : memref<8x64xf32, #tpu.memory_space<vmem>>, vector<8x64xf32>
    %242 = arith.mulf %232, %241 : vector<8x64xf32>
    %243 = arith.mulf %231, %234 : vector<8x64xf32>
    %244 = arith.addf %242, %243 : vector<8x64xf32>
    %245 = math.tanh %244 : vector<8x64xf32>
    %246 = arith.mulf %240, %245 : vector<8x64xf32>
    %c0_112 = arith.constant 0 : index
    %c0_113 = arith.constant 0 : index
    %247 = vector.load %arg10[%c0_112, %c0_113] : memref<8x64xf32, #tpu.memory_space<vmem>>, vector<8x64xf32>
    tpu.vector_store %arg10[%c0_112, %c0_113], %244 {strides = array<i32>} : memref<8x64xf32, #tpu.memory_space<vmem>>, vector<8x64xf32>,
    %c0_114 = arith.constant 0 : index
    %c0_115 = arith.constant 0 : index
    %248 = vector.load %arg9[%c0_114, %c0_115] : memref<8x64xf32, #tpu.memory_space<vmem>>, vector<8x64xf32>
    tpu.vector_store %arg9[%c0_114, %c0_115], %246 {strides = array<i32>} : memref<8x64xf32, #tpu.memory_space<vmem>>, vector<8x64xf32>,
    %c0_116 = arith.constant 0 : index
    %c0_117 = arith.constant 0 : index
    %249 = vector.load %arg9[%c0_116, %c0_117] : memref<8x64xf32, #tpu.memory_space<vmem>>, vector<8x64xf32>
    %c0_118 = arith.constant 0 : index
    %c0_119 = arith.constant 0 : index
    %250 = vector.load %arg11[%c0_118, %c0_119] : memref<8x64xf32, #tpu.memory_space<vmem>>, vector<8x64xf32>
    tpu.vector_store %arg11[%c0_118, %c0_119], %249 {strides = array<i32>} : memref<8x64xf32, #tpu.memory_space<vmem>>, vector<8x64xf32>,
    %c0_120 = arith.constant 0 : index
    %c0_121 = arith.constant 0 : index
    %251 = vector.load %arg11[%c0_120, %c0_121] : memref<8x64xf32, #tpu.memory_space<vmem>>, vector<8x64xf32>
    %c0_122 = arith.constant 0 : index
    %c0_123 = arith.constant 0 : index
    %252 = vector.load %arg5[%c0_122, %c0_123] : memref<64x32xf32, #tpu.memory_space<vmem>>, vector<64x32xf32>
    %cst_124 = arith.constant dense<0.000000e+00> : vector<8x32xf32>
    %253 = tpu.matmul %251, %252, %cst_124 {dimension_numbers = #tpu.dot_dimension_numbers<[1], [0], [0], [1], [0, 0, 1, 1], [], []>} : vector<8x64xf32>, vector<64x32xf32>, vector<8x32xf32> -> vector<8x32xf32>
    %c0_125 = arith.constant 0 : index
    %c0_126 = arith.constant 0 : index
    %254 = vector.load %arg6[%c0_125, %c0_126] : memref<1x32xf32, #tpu.memory_space<vmem>>, vector<1x32xf32>
    %255 = vector.broadcast %254 : vector<1x32xf32> to vector<8x32xf32>
    %256 = arith.addf %253, %255 : vector<8x32xf32>
    %257 = tpu.iota {dimensions = array<i32: 1>} : vector<8x32xi32>
    %c16_i32 = arith.constant 16 : i32
    %258 = vector.broadcast %c16_i32 : i32 to vector<8x32xi32>
    %259 = arith.cmpi sge, %257, %258 : vector<8x32xi32>
    %cst_127 = arith.constant 2.000000e+01 : f32
    %260 = vector.broadcast %cst_127 : f32 to vector<8x32xf32>
    %261 = arith.cmpf ogt, %256, %260 : vector<8x32xf32>
    %cst_128 = arith.constant 2.000000e+01 : f32
    %262 = vector.broadcast %cst_128 : f32 to vector<8x32xf32>
    %263 = arith.minimumf %256, %262 : vector<8x32xf32>
    %264 = math.exp %263 : vector<8x32xf32>
    %265 = math.log1p %264 : vector<8x32xf32>
    %266 = arith.select %261, %256, %265 : vector<8x32xi1>, vector<8x32xf32>
    %267 = arith.select %259, %266, %256 : vector<8x32xi1>, vector<8x32xf32>
    %c0_129 = arith.constant 0 : index
    %c0_130 = arith.constant 0 : index
    %268 = vector.load %arg7[%c0_129, %c0_130] : memref<8x32xf32, #tpu.memory_space<vmem>>, vector<8x32xf32>
    tpu.vector_store %arg7[%c0_129, %c0_130], %267 {strides = array<i32>} : memref<8x32xf32, #tpu.memory_space<vmem>>, vector<8x32xf32>,
    return
  }
}

</mosaic_0001>

<bundles_post_ra>
// kernel: tpu_custom_call.1
= control target key start
LH: loop header
LB: loop body
LE: loop exit
PB: predicated region body
PF: predicated region fallthrough
CT: control target
= control target key end

     0   :  { %12 = vsyncpa [#allocation7], 0  ;;  %s2375_s0 = inlined_call_operand.vmem [shape: s32[64,1], index: 0, kind: input, shape index: {}]   ;;  %s2376_s1 = inlined_call_operand.vmem [shape: s32[64,1], index: 1, kind: input, shape index: {}]   ;;  %s2377_s2 = inlined_call_operand.hbm [shape: f32[256,256], index: 2, kind: input, shape index: {}]   ;;  %s2378_s3 = inlined_call_operand.vmem [shape: f32[1,256], index: 3, kind: input, shape index: {}]   ;;  %s2379_s4 = inlined_call_operand.vmem [shape: f32[64,256], index: 4, kind: input, shape index: {}]   ;;  %s2380_s5 = inlined_call_operand.vmem [shape: f32[64,32], index: 5, kind: input, shape index: {}]   ;;  %s2381_s6 = inlined_call_operand.vmem [shape: f32[1,32], index: 6, kind: input, shape index: {}]   ;;  %s2382_s7 = inlined_call_operand.hbm [shape: f32[8,32], index: 7, kind: output, shape index: {}]  }
   0x1   :  { %13 = vsyncpa [#allocation8], 0  ;;  %s1801_s24 = smov [#allocation6]  }
   0x2   :  { %s23_s25 = sshll.u32 %s1801_s24, 4  ;;  %s24_s25 = int_to_ptr.vmem [resolvable:$true] %s23_s25 }
   0x3   :  { %s1765_s26 = scalar_lea.vmem %s24_s25, 8192  ;;  %p1770_p1 = scmp.lt.s32.totalorder %s24_s25, %s24_s25 }
   0x4   :  { %p1766_p0 = scmp.ne.s32.totalorder %s24_s25, %s1765_s26  ;;  %p1771_p2 = scmp.lt.s32.totalorder %s1765_s26, %s1765_s26 }
   0x6   :  { %p1772_p3 = por %p1771_p2, %p1770_p1 }
   0x8   :  { %p1773_p4 = pnand %p1772_p3, %p1766_p0 }
   0xa   :  { %1776 = shalt.err (!%p1773_p4)
}
   0xb   :  { %s1802_s27 = smov 256   ;;  %s1803_s28 = smov 16  }
   0xc   :  { %29 = dma.hbm_to_vmem [thread:$0]  %s2377_s2, 8192, %s24_s25, [#allocation7], %s1802_s27, %s1802_s27, %s1803_s28  }
   0xd   :  { %1797 = dma.done.wait [#allocation7], 8192  }
   0xe   :  { %1798 = vsyncadd [#allocation7], 4294959104  ;;  %vm489_vm0 = vcmask 523264   ;;  %v1804_v0 = vmov 0   ;;  %v1805_v1 = vmov 0.0   ;;  %v101_v2 = vld [vmem:[%s2376_s1 + $0x10] sm:$0xff] }
   0xf   :  { %1656 = vset.pattern.permute.xlu1 %v1804_v0  ;;  %1655 = vset.pattern.permute.xlu0 %v1804_v0  ;;  %491 = vst.msk [vmem:[#allocation4] sm:$0xff] %vm489_vm0, %v1805_v1  ;;  %490 = vst.msk [vmem:[#allocation3] sm:$0xff] %vm489_vm0, %v1805_v1  ;;  %v99_v3 = vld [vmem:[%s2376_s1] sm:$0xff]  ;;  %v102_v4 = vld [vmem:[%s2376_s1 + $0x18] sm:$0xff]  ;;  %s1806_s25 = smov 64  }
  0x10   :  { %283 = vmatprep.mubr.f32.mxu0 %v1805_v1  ;;  %396 = vmatprep.mubr.f32.mxu1 %v1805_v1  ;;  %v100_v5 = vld [vmem:[%s2376_s1 + $0x8] sm:$0xff]  ;;  %v218_v6 = vld [vmem:[#allocation6 + $0x1f8] sm:$0xff]  ;;  %v216_v8 = vld [vmem:[#allocation6 + $0x1e8] sm:$0xff] }
  0x11   :  { %114 = vperm.xlu1 %1656, %v101_v2   ;;  %108 = vperm.xlu0 %1655, %v99_v3   ;;  %v217_v7 = vld [vmem:[#allocation6 + $0x1f0] sm:$0xff]  ;;  %v103_v10 = vld [vmem:[%s2376_s1 + $0x20] sm:$0xff]  ;;  %v215_v11 = vld [vmem:[#allocation6 + $0x1e0] sm:$0xff] }
  0x12   :  { %v104_v9 = vld [vmem:[%s2376_s1 + $0x28] sm:$0xff]  ;;  %219 = vmatprep.subr.mxu0 %v218_v6  ;;  %v214_v12 = vld [vmem:[#allocation6 + $0x1d8] sm:$0xff]  ;;  %v43_v16 = vld [vmem:[%s2375_s0] sm:$0xff] }
  0x13   :  { %220 = vmatpush1.msra.mxu0 %v217_v7  ;;  %v105_v13 = vld [vmem:[%s2376_s1 + $0x30] sm:$0xff]  ;;  %v213_v14 = vld [vmem:[#allocation6 + $0x1d0] sm:$0xff]  ;;  %v184_v18 = vld [vmem:[#allocation6 + $0xe8] sm:$0xff] }
  0x14   :  { %221 = vmatprep.subr.mxu0 %v216_v8  ;;  %v186_v15 = vld [vmem:[#allocation6 + $0xf8] sm:$0xff]  ;;  %v185_v17 = vld [vmem:[#allocation6 + $0xf0] sm:$0xff]  ;;  %v212_v19 = vld [vmem:[#allocation6 + $0x1c8] sm:$0xff] }
  0x15   :  { %117 = vperm.xlu1 %1656, %v102_v4   ;;  %111 = vperm.xlu0 %1655, %v100_v5   ;;  %v183_v20 = vld [vmem:[#allocation6 + $0xe0] sm:$0xff]  ;;  %v182_v22 = vld [vmem:[#allocation6 + $0xd8] sm:$0xff]  ;;  %v181_v24 = vld [vmem:[#allocation6 + $0xd0] sm:$0xff] }
  0x16   :  { %222 = vmatpush1.msra.mxu0 %v215_v11  ;;  %332 = vmatprep.subr.mxu1 %v186_v15  ;;  %v211_v21 = vld [vmem:[#allocation6 + $0x1c0] sm:$0xff]  ;;  %v210_v23 = vld [vmem:[#allocation6 + $0x1b8] sm:$0xff]  ;;  %v600_v26 = vld [vmem:[#allocation4] sm:$0xff] }
  0x17   :  { %223 = vmatprep.subr.mxu0 %v214_v12  ;;  %333 = vmatpush1.msra.mxu1 %v185_v17  ;;  %v106_v25 = vld [vmem:[%s2376_s1 + $0x38] sm:$0xff]  ;;  %v209_v27 = vld [vmem:[#allocation6 + $0x1b0] sm:$0xff]  ;;  %v180_v28 = vld [vmem:[#allocation6 + $0xc8] sm:$0xff] }
  0x18   :  { %224 = vmatpush1.msra.mxu0 %v213_v14  ;;  %334 = vmatprep.subr.mxu1 %v184_v18  ;;  %v208_v29 = vld [vmem:[#allocation6 + $0x1a8] sm:$0xff]  ;;  %v179_v30 = vld [vmem:[#allocation6 + $0xc0] sm:$0xff]  ;;  %v178_v32 = vld [vmem:[#allocation6 + $0xb8] sm:$0xff]  ;;  %v41_v18 = vlaneseq }
  0x19   :  { %123 = vperm.xlu1 %1656, %v104_v9   ;;  %120 = vperm.xlu0 %1655, %v103_v10   ;;  %v207_v31 = vld [vmem:[#allocation6 + $0x1a0] sm:$0xff]  ;;  %v44_v33 = vld [vmem:[%s2375_s0 + $0x8] sm:$0xff]  ;;  %v206_v34 = vld [vmem:[#allocation6 + $0x198] sm:$0xff] }
  0x1a   :  { %225 = vmatprep.subr.mxu0 %v212_v19  ;;  %335 = vmatpush1.msra.mxu1 %v183_v20  ;;  %v205_v35 = vld [vmem:[#allocation6 + $0x190] sm:$0xff]  ;;  %v204_v37 = vld [vmem:[#allocation6 + $0x188] sm:$0xff]  ;;  %v203_v39 = vld [vmem:[#allocation6 + $0x180] sm:$0xff]  ;;  %v1907_v19 = vand.u32 127, %v41_v18 }
  0x1b   :  { %226 = vmatpush1.msra.mxu0 %v211_v21  ;;  %336 = vmatprep.subr.mxu1 %v182_v22  ;;  %v177_v36 = vld [vmem:[#allocation6 + $0xb0] sm:$0xff]  ;;  %v176_v38 = vld [vmem:[#allocation6 + $0xa8] sm:$0xff]  ;;  %v175_v40 = vld [vmem:[#allocation6 + $0xa0] sm:$0xff] }
  0x1c   :  { %227 = vmatprep.subr.mxu0 %v210_v23  ;;  %337 = vmatpush1.msra.mxu1 %v181_v24  ;;  %v46_v41 = vld [vmem:[%s2375_s0 + $0x18] sm:$0xff]  ;;  %v202_v42 = vld [vmem:[#allocation6 + $0x178] sm:$0xff]  ;;  %v201_v43 = vld [vmem:[#allocation6 + $0x170] sm:$0xff]  ;;  %v1807_v24 = vmov 1.0  }
  0x1d   :  { %126 = vperm.xlu0 %1655, %v105_v13   ;;  %52 = vperm.xlu1 %1656, %v43_v16   ;;  %v174_v44 = vld [vmem:[#allocation6 + $0x98] sm:$0xff]  ;;  %v200_v45 = vld [vmem:[#allocation6 + $0x168] sm:$0xff]  ;;  %v173_v46 = vld [vmem:[#allocation6 + $0x90] sm:$0xff] }
  0x1e   :  { %228 = vmatpush1.msra.mxu0 %v209_v27  ;;  %338 = vmatprep.subr.mxu1 %v180_v28  ;;  %v199_v47 = vld [vmem:[#allocation6 + $0x160] sm:$0xff]  ;;  %v172_v48 = vld [vmem:[#allocation6 + $0x88] sm:$0xff]  ;;  %v48_v49 = vld [vmem:[%s2375_s0 + $0x28] sm:$0xff] }
  0x1f   :  { %229 = vmatprep.subr.mxu0 %v208_v29  ;;  %339 = vmatpush1.msra.mxu1 %v179_v30  ;;  %v198_v50 = vld [vmem:[#allocation6 + $0x158] sm:$0xff]  ;;  %v197_v51 = vld [vmem:[#allocation6 + $0x150] sm:$0xff]  ;;  %v171_v52 = vld [vmem:[#allocation6 + $0x80] sm:$0xff] }
  0x20   :  { %230 = vmatpush1.msra.mxu0 %v207_v31  ;;  %340 = vmatprep.subr.mxu1 %v178_v32  ;;  %v196_v53 = vld [vmem:[#allocation6 + $0x148] sm:$0xff]  ;;  %v170_v54 = vld [vmem:[#allocation6 + $0x78] sm:$0xff]  ;;  %v195_v55 = vld [vmem:[#allocation6 + $0x140] sm:$0xff] }
  0x21   :  { %129 = vperm.xlu0 %1655, %v106_v25   ;;  %602 = vrot.lane.b32.xlu1 %v600_v26, %s1806_s25  ;;  %v169_v56 = vld [vmem:[#allocation6 + $0x70] sm:$0xff]  ;;  %v50_v57 = vld [vmem:[%s2375_s0 + $0x38] sm:$0xff]  ;;  %v194_v58 = vld [vmem:[#allocation6 + $0x138] sm:$0xff] }
  0x22   :  { %231 = vmatprep.subr.mxu0 %v206_v34  ;;  %341 = vmatpush1.msra.mxu1 %v177_v36  ;;  %v193_v59 = vld [vmem:[#allocation6 + $0x130] sm:$0xff]  ;;  %v168_v60 = vld [vmem:[#allocation6 + $0x68] sm:$0xff]  ;;  %v167_v62 = vld [vmem:[#allocation6 + $0x60] sm:$0xff] }
  0x23   :  { %232 = vmatpush1.msra.mxu0 %v205_v35  ;;  %342 = vmatprep.subr.mxu1 %v176_v38  ;;  %v192_v61 = vld [vmem:[#allocation6 + $0x128] sm:$0xff]  ;;  %v191_v63 = vld [vmem:[#allocation6 + $0x120] sm:$0xff]  ;;  %v166_v0 = vld [vmem:[#allocation6 + $0x58] sm:$0xff] }
  0x24   :  { %233 = vmatprep.subr.mxu0 %v204_v37  ;;  %343 = vmatpush1.msra.mxu1 %v175_v40  ;;  %v190_v2 = vld [vmem:[#allocation6 + $0x118] sm:$0xff]  ;;  %v165_v3 = vld [vmem:[#allocation6 + $0x50] sm:$0xff]  ;;  %v164_v5 = vld [vmem:[#allocation6 + $0x48] sm:$0xff] }
  0x25   :  { %55 = vperm.xlu1 %1656, %v44_v33   ;;  %234 = vmatpush1.msra.mxu0 %v203_v39  ;;  %v189_v4 = vld [vmem:[#allocation6 + $0x110] sm:$0xff]  ;;  %v188_v6 = vld [vmem:[#allocation6 + $0x108] sm:$0xff]  ;;  %v163_v7 = vld [vmem:[#allocation6 + $0x40] sm:$0xff] }
  0x26   :  { %235 = vmatprep.subr.mxu0 %v202_v42  ;;  %344 = vmatprep.subr.mxu1 %v174_v44  ;;  %v187_v8 = vld [vmem:[#allocation6 + $0x100] sm:$0xff]  ;;  %v162_v9 = vld [vmem:[#allocation6 + $0x38] sm:$0xff]  ;;  %v161_v11 = vld [vmem:[#allocation6 + $0x30] sm:$0xff] }
  0x27   :  { %236 = vmatpush1.msra.mxu0 %v201_v43  ;;  %345 = vmatpush1.msra.mxu1 %v173_v46  ;;  %v1902_v10 = vld [vmem:[%s2379_s4 + $0x78] sm:$0xff]  ;;  %v160_v12 = vld [vmem:[#allocation6 + $0x28] sm:$0xff]  ;;  %v158_v14 = vld [vmem:[#allocation6 + $0x18] sm:$0xff] }
  0x28   :  { %237 = vmatprep.subr.mxu0 %v200_v45  ;;  %346 = vmatprep.subr.mxu1 %v172_v48  ;;  %v159_v13 = vld [vmem:[#allocation6 + $0x20] sm:$0xff]  ;;  %v157_v15 = vld [vmem:[#allocation6 + $0x10] sm:$0xff]  ;;  %v156_v16 = vld [vmem:[#allocation6 + $0x8] sm:$0xff] }
  0x29   :  { %61 = vperm.xlu1 %1656, %v46_v41   ;;  %238 = vmatpush1.msra.mxu0 %v199_v47  ;;  %v155_v17 = vld [vmem:[#allocation6] sm:$0xff]  ;;  %v1912_v22 = vld [vmem:[%s2379_s4 + $0x70] sm:$0xff]  ;;  %v1918_v23 = vld [vmem:[%s2379_s4 + $0x68] sm:$0xff] }
  0x2a   :  { %239 = vmatprep.subr.mxu0 %v198_v50  ;;  %347 = vmatpush1.msra.mxu1 %v171_v52  ;;  %v1924_v25 = vld [vmem:[%s2379_s4 + $0x60] sm:$0xff]  ;;  %v1931_v26 = vld [vmem:[%s2379_s4 + $0x58] sm:$0xff]  ;;  %v1937_v29 = vld [vmem:[%s2379_s4 + $0x50] sm:$0xff] }
  0x2b   :  { %240 = vmatpush1.msra.mxu0 %v197_v51  ;;  %348 = vmatprep.subr.mxu1 %v170_v54  ;;  %v1944_v30 = vld [vmem:[%s2379_s4 + $0x48] sm:$0xff]  ;;  %v1951_v31 = vld [vmem:[%s2379_s4 + $0x40] sm:$0xff]  ;;  %v1959_v32 = vld [vmem:[%s2379_s4 + $0x38] sm:$0xff] }
  0x2c   :  { %241 = vmatprep.subr.mxu0 %v196_v53  ;;  %349 = vmatpush1.msra.mxu1 %v169_v56  ;;  %v1965_v34 = vld [vmem:[%s2379_s4 + $0x30] sm:$0xff]  ;;  %v1971_v35 = vld [vmem:[%s2379_s4 + $0x28] sm:$0xff]  ;;  %v1978_v36 = vld [vmem:[%s2379_s4 + $0x20] sm:$0xff] }
  0x2d   :  { %67 = vperm.xlu1 %1656, %v48_v49   ;;  %242 = vmatpush1.msra.mxu0 %v195_v55  ;;  %v1989_v38 = vld [vmem:[%s2379_s4 + $0x18] sm:$0xff]  ;;  %v1996_v40 = vld [vmem:[%s2379_s4 + $0x10] sm:$0xff]  ;;  %v2003_v41 = vld [vmem:[%s2379_s4 + $0x8] sm:$0xff] }
  0x2e   :  { %243 = vmatprep.subr.mxu0 %v194_v58  ;;  %350 = vmatprep.subr.mxu1 %v168_v60  ;;  %v2011_v43 = vld [vmem:[%s2379_s4] sm:$0xff]  ;;  %v448_v58 = vshrl.u32 %v41_v18, 7 }
  0x2f   :  { %244 = vmatpush1.msra.mxu0 %v193_v59  ;;  %351 = vmatpush1.msra.mxu1 %v167_v62  ;;  %v510_v47 = vld [vmem:[#allocation3] sm:$0xff] }
  0x30   :  { %245 = vmatprep.subr.mxu0 %v192_v61  ;;  %352 = vmatprep.subr.mxu1 %v166_v0  ;;  %v449_v61 = vsub.s32 0, %v448_v58  ;;  %v445_v0 = vld [vmem:[%s2378_s3] sm:$0x3] }
  0x31   :  { %73 = vperm.xlu1 %1656, %v50_v57   ;;  %246 = vmatpush1.msra.mxu0 %v191_v63 }
  0x32   :  { %247 = vmatprep.subr.mxu0 %v190_v2  ;;  %353 = vmatpush1.msra.mxu1 %v165_v3 }
  0x33   :  { %248 = vmatpush1.msra.mxu0 %v189_v4  ;;  %354 = vmatprep.subr.mxu1 %v164_v5  ;;  %v2094_v4 = vrot.slane %v445_v0, %v449_v61 }
  0x34   :  { %249 = vmatprep.subr.mxu0 %v188_v6  ;;  %355 = vmatpush1.msra.mxu1 %v163_v7 }
  0x35   :  { %250 = vmatpush1.msra.mxu0 %v187_v8  ;;  %356 = vmatprep.subr.mxu1 %v162_v9 }
  0x36   :  { %530 = vmatprep.subr.mxu0 %v1902_v10  ;;  %357 = vmatpush1.msra.mxu1 %v161_v11 }
  0x37   :  { %358 = vmatprep.subr.mxu1 %v160_v12  ;;  %v453_v12 = vsub.s32 1, %v448_v58 }
  0x38   :  { %359 = vmatpush1.msra.mxu1 %v159_v13 }
  0x39   :  { %360 = vmatprep.subr.mxu1 %v158_v14 }
  0x3a   :  { %361 = vmatpush1.msra.mxu1 %v157_v15  ;;  %v2101_v15 = vrot.slane %v445_v0, %v453_v12 }
  0x3b   :  { %362 = vmatprep.subr.mxu1 %v156_v16 }
  0x3c   :  { %363 = vmatpush1.msra.mxu1 %v155_v17 }
  0x3d   :  { %646 = vmatprep.subr.mxu1 %v1902_v10 }
  0x8c   :  { %v115_v20 = vpop.permute.xlu1 %114  ;;  %v109_v21 = vpop.permute.xlu0 %108 }
  0x8d   :  { %vm131_vm1 = vcmp.eq.s32.totalorder %v109_v21, %v1907_v19  ;;  %vm133_vm3 = vcmp.eq.s32.totalorder %v115_v20, %v1907_v19 }
  0x8e   :  { %1576 = vmatmul.mubr.msk.f32.vlgmr.msra.gmra.mxu0 %vm131_vm1, %v1807_v24 }
  0x8f   :  { %531 = vmatpush1.msra.mxu0 %v1912_v22  ;;  %289 = vmatprep.mubr.f32.mxu0 %v1805_v1 }
  0x90   :  { %v118_v27 = vpop.permute.xlu1 %117  ;;  %v112_v28 = vpop.permute.xlu0 %111  ;;  %532 = vmatprep.subr.mxu0 %v1918_v23 }
  0x91   :  { %vm132_vm2 = vcmp.eq.s32.totalorder %v112_v28, %v1907_v19  ;;  %533 = vmatpush1.msra.mxu0 %v1924_v25  ;;  %vm134_vm4 = vcmp.eq.s32.totalorder %v118_v27, %v1907_v19 }
  0x92   :  { %1577 = vmatmul.mubr.msk.f32.gmra.mxu0 %vm132_vm2, %v1807_v24  ;;  %534 = vmatprep.subr.mxu0 %v1931_v26  ;;  %vm1808_vm2 = vmmov 0  }
  0x93   :  { %295 = vmatprep.mubr.f32.mxu0 %v1805_v1  ;;  %535 = vmatpush1.msra.mxu0 %v1937_v29 }
  0x94   :  { %v124_v33 = vpop.permute.xlu1 %123  ;;  %536 = vmatprep.subr.mxu0 %v1944_v30  ;;  %v121_v39 = vpop.permute.xlu0 %120 }
  0x95   :  { %537 = vmatpush1.msra.mxu0 %v1951_v31  ;;  %vm135_vm6 = vcmp.eq.s32.totalorder %v121_v39, %v1907_v19  ;;  %vm136_vm7 = vcmp.eq.s32.totalorder %v124_v33, %v1907_v19  ;;  %v47_v39 = vld [vmem:[%s2375_s0 + $0x20] sm:$0xff] }
  0x96   :  { %1578 = vmatmul.mubr.msk.f32.gmra.mxu0 %vm133_vm3, %v1807_v24  ;;  %538 = vmatprep.subr.mxu0 %v1959_v32 }
  0x97   :  { %301 = vmatprep.mubr.f32.mxu0 %v1805_v1  ;;  %539 = vmatpush1.msra.mxu0 %v1965_v34 }
  0x98   :  { %v53_v37 = vpop.permute.xlu1 %52  ;;  %540 = vmatprep.subr.mxu0 %v1971_v35  ;;  %v127_v44 = vpop.permute.xlu0 %126 }
  0x99   :  { %vm75_vm5 = vcmp.eq.s32.totalorder %v53_v37, %v1907_v19  ;;  %541 = vmatpush1.msra.mxu0 %v1978_v36  ;;  %vm137_vm9 = vcmp.eq.s32.totalorder %v127_v44, %v1907_v19  ;;  %v45_v37 = vld [vmem:[%s2375_s0 + $0x10] sm:$0xff] }
  0x9a   :  { %1579 = vmatmul.mubr.msk.f32.gmra.mxu0 %vm134_vm4, %v1807_v24  ;;  %1584 = vmatmul.mubr.msk.f32.vlgmr.msra.gmra.mxu1 %vm75_vm5, %v1807_v24  ;;  %v49_v44 = vld [vmem:[%s2375_s0 + $0x30] sm:$0xff]  ;;  %vm1543_vm5 = vcmask 261120  }
  0x9b   :  { %307 = vmatprep.mubr.f32.mxu0 %v1805_v1  ;;  %402 = vmatprep.mubr.f32.mxu1 %v1805_v1 }
  0x9c   :  { %v2005_v42 = vpop.permute.xlu1 %602  ;;  %542 = vmatprep.subr.mxu0 %v1989_v38  ;;  %647 = vmatpush1.msra.mxu1 %v1912_v22  ;;  %v130_v46 = vpop.permute.xlu0 %129 }
  0x9d   :  { %543 = vmatpush1.msra.mxu0 %v1996_v40  ;;  %648 = vmatprep.subr.mxu1 %v1918_v23  ;;  %vm138_vm10 = vcmp.eq.s32.totalorder %v130_v46, %v1907_v19 }
  0x9e   :  { %1580 = vmatmul.mubr.msk.f32.gmra.mxu0 %vm135_vm6, %v1807_v24  ;;  %544 = vmatprep.subr.mxu0 %v2003_v41 }
  0x9f   :  { %313 = vmatprep.mubr.f32.mxu0 %v1805_v1  ;;  %545 = vmatpush1.msra.mxu0 %v2011_v43 }
  0xa0   :  { %v56_v45 = vpop.permute.xlu1 %55  ;;  %649 = vmatpush1.msra.mxu1 %v1924_v25  ;;  %762 = vmatprep.subr.mxu0 %v1902_v10 }
  0xa1   :  { %vm76_vm8 = vcmp.eq.s32.totalorder %v56_v45, %v1907_v19  ;;  %650 = vmatprep.subr.mxu1 %v1931_v26 }
  0xa2   :  { %1581 = vmatmul.mubr.msk.f32.gmra.mxu0 %vm136_vm7, %v1807_v24  ;;  %1585 = vmatmul.mubr.msk.f32.gmra.mxu1 %vm76_vm8, %v1807_v24 }
  0xa3   :  { %319 = vmatprep.mubr.f32.mxu0 %v1805_v1  ;;  %408 = vmatprep.mubr.f32.mxu1 %v1805_v1 }
  0xa4   :  { %651 = vmatpush1.msra.mxu1 %v1937_v29  ;;  %v62_v0 = vpop.permute.xlu1 %61 }
  0xa5   :  { %652 = vmatprep.subr.mxu1 %v1944_v30  ;;  %vm78_vm12 = vcmp.eq.s32.totalorder %v62_v0, %v1907_v19 }
  0xa6   :  { %1582 = vmatmul.mubr.msk.f32.gmra.mxu0 %vm137_vm9, %v1807_v24  ;;  %653 = vmatpush1.msra.mxu1 %v1951_v31 }
  0xa7   :  { %325 = vmatprep.mubr.f32.mxu0 %v1805_v1  ;;  %654 = vmatprep.subr.mxu1 %v1959_v32 }
  0xa8   :  { %655 = vmatpush1.msra.mxu1 %v1965_v34 }
  0xa9   :  { %656 = vmatprep.subr.mxu1 %v1971_v35 }
  0xaa   :  { %1583 = vmatmul.mubr.msk.f32.gmra.mxu0 %vm138_vm10, %v1807_v24  ;;  %657 = vmatpush1.msra.mxu1 %v1978_v36 }
  0xab   :  { %578 = vmatprep.mubr.f32.mxu0 %v1805_v1  ;;  %658 = vmatprep.subr.mxu1 %v1989_v38 }
  0xac   :  { %659 = vmatpush1.msra.mxu1 %v1996_v40 }
  0xad   :  { %660 = vmatprep.subr.mxu1 %v2003_v41 }
  0xae   :  { %1592 = vmatmul.mubr.msk.f32.vlgmr.msra.gmra.mxu0 %vm489_vm0, %v510_v47  ;;  %661 = vmatpush1.msra.mxu1 %v2011_v43 }
  0xaf   :  { %763 = vmatpush1.msra.mxu0 %v1912_v22  ;;  %810 = vmatprep.mubr.f32.mxu0 %v1805_v1 }
  0xb0   :  { %764 = vmatprep.subr.mxu0 %v1918_v23  ;;  %878 = vmatprep.subr.mxu1 %v1902_v10 }
  0xb1   :  { %765 = vmatpush1.msra.mxu0 %v1924_v25 }
  0xb2   :  { %766 = vmatprep.subr.mxu0 %v1931_v26 }
  0xb3   :  { %767 = vmatpush1.msra.mxu0 %v1937_v29 }
  0xb4   :  { %768 = vmatprep.subr.mxu0 %v1944_v30 }
  0xb5   :  { %769 = vmatpush1.msra.mxu0 %v1951_v31 }
  0xb6   :  { %770 = vmatprep.subr.mxu0 %v1959_v32 }
  0xb7   :  { %771 = vmatpush1.msra.mxu0 %v1965_v34 }
  0xb8   :  { %772 = vmatprep.subr.mxu0 %v1971_v35 }
  0xb9   :  { %773 = vmatpush1.msra.mxu0 %v1978_v36 }
  0xba   :  { %774 = vmatprep.subr.mxu0 %v1989_v38 }
  0xbb   :  { %775 = vmatpush1.msra.mxu0 %v1996_v40 }
  0xbc   :  { %776 = vmatprep.subr.mxu0 %v2003_v41 }
  0xbd   :  { %777 = vmatpush1.msra.mxu0 %v2011_v43 }
  0xbe   :  { %994 = vmatprep.subr.mxu0 %v1902_v10 }
 0x14e   :  { %v285_v48 = vpop.f32.mrf.mxu0 }
 0x150   :  { %v287_v49 = vpop.f32.mrf.mxu0 }
 0x152   :  { %v2066_v50 = vpop.f32.mrf.mxu0 }
 0x154   :  { %v2068_v51 = vpop.f32.mrf.mxu0 }
 0x156   :  { %v2070_v52 = vpop.f32.mrf.mxu0 }
 0x158   :  { %v2072_v53 = vpop.f32.mrf.mxu0 }
 0x15a   :  { %v2074_v54 = vpop.f32.mrf.mxu0  ;;  %v398_v62 = vpop.f32.mrf.mxu1 }
 0x15b   :  { %v399_v3 = vadd.f32 %v398_v62, %v285_v48 }
 0x15c   :  { %v2076_v55 = vpop.f32.mrf.mxu0  ;;  %v400_v13 = vpop.f32.mrf.mxu1 }
 0x15d   :  { %v457_v7 = vadd.f32 %v2094_v4, %v399_v3  ;;  %v401_v14 = vadd.f32 %v400_v13, %v287_v49 }
 0x15e   :  { %v2078_v56 = vpop.f32.mrf.mxu0 }
 0x15f   :  { %v458_v17 = vadd.f32 %v2101_v15, %v401_v14 }
 0x160   :  { %v2080_v57 = vpop.f32.mrf.mxu0 }
 0x162   :  { %v2083_v59 = vpop.f32.mrf.mxu0 }
 0x164   :  { %v2085_v60 = vpop.f32.mrf.mxu0 }
 0x166   :  { %v2087_v63 = vpop.f32.mrf.mxu0 }
 0x168   :  { %v2092_v2 = vpop.f32.mrf.mxu0 }
 0x16a   :  { %v2096_v5 = vpop.f32.mrf.mxu0 }
 0x16c   :  { %v2098_v6 = vpop.f32.mrf.mxu0 }
 0x16e   :  { %v580_v8 = vpop.f32.mrf.mxu0 }
 0x16f   :  { %v585_v9 = vadd.f32 %v580_v8, %v457_v7  ;;  %v68_v8 = vpop.permute.xlu1 %67 }
 0x170   :  { %v582_v16 = vpop.f32.mrf.mxu0  ;;  %vm80_vm14 = vcmp.eq.s32.totalorder %v68_v8, %v1907_v19 }
 0x171   :  { %v1593_v11 = vmul.f32 -1.442695, %v585_v9  ;;  %v586_v18 = vadd.f32 %v582_v16, %v458_v17 }
 0x173   :  { %1657 = vpow2.f32 %v1593_v11  ;;  %v1594_v45 = vmul.f32 -1.442695, %v586_v18  ;;  %v74_v11 = vpop.permute.xlu1 %73 }
 0x174   :  { %1659 = vtanh.f32 %v586_v18  ;;  %vm82_vm1 = vcmp.eq.s32.totalorder %v74_v11, %v1907_v19 }
 0x180   :  { %v1658_v20 = vpop.eup %1657 }
 0x181   :  { %v590_v21 = vadd.f32 1.0, %v1658_v20  ;;  %v1660_v27 = vpop.eup %1659 }
 0x183   :  { %1661 = vrcp.f32 %v590_v21 }
 0x184   :  { %1663 = vpow2.f32 %v1594_v45 }
 0x190   :  { %v1662_v28 = vpop.eup %1661 }
 0x191   :  { %v606_v33 = vmul.f32 %v1662_v28, %v1660_v27  ;;  %v1664_v46 = vpop.eup %1663  ;;  %v605_v48 = vmul.f32 %v1662_v28, %v2005_v42 }
 0x192   :  { %v597_v47 = vadd.f32 1.0, %v1664_v46 }
 0x193   :  { %608 = vrot.lane.b32.xlu0 %v606_v33, %s1806_s25 }
 0x194   :  { %1665 = vrcp.f32 %v597_v47 }
 0x197   :  { %58 = vperm.xlu0 %1655, %v45_v37  }
 0x19b   :  { %64 = vperm.xlu0 %1655, %v47_v39  }
 0x19f   :  { %70 = vperm.xlu0 %1655, %v49_v44  }
 0x1a1   :  { %v1666_v62 = vpop.eup %1665 }
 0x205   :  { %v609_v49 = vpop.permute.xlu0 %608 }
 0x206   :  { %v611_v58 = vadd.f32 %v609_v49, %v605_v48 }
 0x208   :  { %1667 = vtanh.f32 %v611_v58  ;;  %615 = vrot.lane.b32.xlu1 %v611_v58, %s1806_s25 }
 0x212   :  { %v59_v61 = vpop.permute.xlu0 %58 }
 0x213   :  { %vm77_vm11 = vcmp.eq.s32.totalorder %v59_v61, %v1907_v19 }
 0x214   :  { %1586 = vmatmul.mubr.msk.f32.gmra.mxu1 %vm77_vm11, %v1807_v24 }
 0x215   :  { %v1668_v3 = vpop.eup %1667  ;;  %414 = vmatprep.mubr.f32.mxu1 %v1805_v1 }
 0x216   :  { %v613_v7 = vmul.f32 %v1668_v3, %v1666_v62  ;;  %v65_v42 = vpop.permute.xlu0 %64 }
 0x217   :  { %vm79_vm13 = vcmp.eq.s32.totalorder %v65_v42, %v1907_v19 }
 0x218   :  { %620 = vrot.lane.b32.xlu0 %v613_v7, %s1806_s25  ;;  %1587 = vmatmul.mubr.msk.f32.gmra.mxu1 %vm78_vm12, %v1807_v24 }
 0x219   :  { %420 = vmatprep.mubr.f32.mxu1 %v1805_v1 }
 0x21a   :  { %v71_v9 = vpop.permute.xlu0 %70 }
 0x21b   :  { %vm81_vm15 = vcmp.eq.s32.totalorder %v71_v9, %v1907_v19 }
 0x21c   :  { %1588 = vmatmul.mubr.msk.f32.gmra.mxu1 %vm79_vm13, %v1807_v24 }
 0x21d   :  { %426 = vmatprep.mubr.f32.mxu1 %v1805_v1 }
 0x220   :  { %1589 = vmatmul.mubr.msk.f32.gmra.mxu1 %vm80_vm14, %v1807_v24 }
 0x221   :  { %432 = vmatprep.mubr.f32.mxu1 %v1805_v1 }
 0x224   :  { %1590 = vmatmul.mubr.msk.f32.gmra.mxu1 %vm81_vm15, %v1807_v24 }
 0x225   :  { %438 = vmatprep.mubr.f32.mxu1 %v1805_v1 }
 0x228   :  { %1591 = vmatmul.mubr.msk.f32.gmra.mxu1 %vm82_vm1, %v1807_v24  ;;  %v404_v24 = vpop.f32.mrf.mxu1 }
 0x229   :  { %694 = vmatprep.mubr.f32.mxu1 %v1805_v1  ;;  %v405_v47 = vadd.f32 %v404_v24, %v2066_v50 }
 0x22a   :  { %v406_v17 = vpop.f32.mrf.mxu1 }
 0x22b   :  { %v459_v49 = vadd.f32 %v2094_v4, %v405_v47  ;;  %v407_v0 = vadd.f32 %v406_v17, %v2068_v51 }
 0x22d   :  { %v460_v7 = vadd.f32 %v2101_v15, %v407_v0 }
 0x27a   :  { %v616_v12 = vpop.permute.xlu1 %615 }
 0x27b   :  { %618 = vst.msk [vmem:[#allocation4] sm:$0xff] %vm489_vm0, %v616_v12 }
 0x282   :  { %v716_v13 = vld [vmem:[#allocation4] sm:$0xff] }
 0x283   :  { %718 = vrot.lane.b32.xlu0 %v716_v13, %s1806_s25 }
 0x28a   :  { %v621_v14 = vpop.permute.xlu0 %620 }
 0x28b   :  { %623 = vst.msk [vmem:[#allocation3] sm:$0xff] %vm489_vm0, %v621_v14 }
 0x292   :  { %v626_v16 = vld [vmem:[#allocation3] sm:$0xff] }
 0x293   :  { %1595 = vmatmul.mubr.msk.f32.vlgmr.msra.gmra.mxu1 %vm489_vm0, %v626_v16 }
 0x294   :  { %879 = vmatpush1.msra.mxu1 %v1912_v22  ;;  %926 = vmatprep.mubr.f32.mxu1 %v1805_v1 }
 0x295   :  { %880 = vmatprep.subr.mxu1 %v1918_v23 }
 0x296   :  { %881 = vmatpush1.msra.mxu1 %v1924_v25 }
 0x297   :  { %882 = vmatprep.subr.mxu1 %v1931_v26 }
 0x298   :  { %883 = vmatpush1.msra.mxu1 %v1937_v29 }
 0x299   :  { %884 = vmatprep.subr.mxu1 %v1944_v30 }
 0x29a   :  { %885 = vmatpush1.msra.mxu1 %v1951_v31 }
 0x29b   :  { %886 = vmatprep.subr.mxu1 %v1959_v32 }
 0x29c   :  { %887 = vmatpush1.msra.mxu1 %v1965_v34 }
 0x29d   :  { %888 = vmatprep.subr.mxu1 %v1971_v35 }
 0x29e   :  { %889 = vmatpush1.msra.mxu1 %v1978_v36 }
 0x29f   :  { %890 = vmatprep.subr.mxu1 %v1989_v38 }
 0x2a0   :  { %891 = vmatpush1.msra.mxu1 %v1996_v40 }
 0x2a1   :  { %892 = vmatprep.subr.mxu1 %v2003_v41 }
 0x2a2   :  { %893 = vmatpush1.msra.mxu1 %v2011_v43 }
 0x2a3   :  { %1110 = vmatprep.subr.mxu1 %v1902_v10 }
 0x2d4   :  { %v2156_v18 = vpop.f32.mrf.mxu1 }
 0x2d6   :  { %v2158_v20 = vpop.f32.mrf.mxu1 }
 0x2d8   :  { %v2160_v21 = vpop.f32.mrf.mxu1 }
 0x2da   :  { %v2162_v27 = vpop.f32.mrf.mxu1 }
 0x2dc   :  { %v2164_v28 = vpop.f32.mrf.mxu1 }
 0x2de   :  { %v2166_v33 = vpop.f32.mrf.mxu1 }
 0x2e0   :  { %v2168_v37 = vpop.f32.mrf.mxu1 }
 0x2e2   :  { %v2170_v39 = vpop.f32.mrf.mxu1 }
 0x2e4   :  { %v2172_v44 = vpop.f32.mrf.mxu1 }
 0x2e6   :  { %v2174_v45 = vpop.f32.mrf.mxu1 }
 0x2e8   :  { %v2176_v46 = vpop.f32.mrf.mxu1 }
 0x2ea   :  { %v2179_v48 = vpop.f32.mrf.mxu1 }
 0x2f5   :  { %v719_v16 = vpop.permute.xlu0 %718 }
 0x353   :  { %v696_v58 = vpop.f32.mrf.mxu1 }
 0x354   :  { %v701_v61 = vadd.f32 %v696_v58, %v459_v49 }
 0x355   :  { %v698_v3 = vpop.f32.mrf.mxu1 }
 0x356   :  { %v1596_v62 = vmul.f32 -1.442695, %v701_v61  ;;  %v702_v42 = vadd.f32 %v698_v3, %v460_v7 }
 0x358   :  { %1669 = vpow2.f32 %v1596_v62  ;;  %v1597_v13 = vmul.f32 -1.442695, %v702_v42 }
 0x359   :  { %1671 = vtanh.f32 %v702_v42  ;;  %v411_v42 = vadd.f32 %v2156_v18, %v2070_v52 }
 0x365   :  { %v1670_v8 = vpop.eup %1669 }
 0x366   :  { %v706_v9 = vadd.f32 1.0, %v1670_v8  ;;  %v1672_v11 = vpop.eup %1671  ;;  %v461_v8 = vadd.f32 %v2094_v4, %v411_v42 }
 0x368   :  { %1673 = vrcp.f32 %v706_v9 }
 0x369   :  { %1675 = vpow2.f32 %v1597_v13 }
 0x375   :  { %v1674_v50 = vpop.eup %1673 }
 0x376   :  { %v722_v12 = vmul.f32 %v1674_v50, %v1672_v11  ;;  %v1676_v14 = vpop.eup %1675  ;;  %v721_v47 = vmul.f32 %v1674_v50, %v719_v16 }
 0x377   :  { %v713_v24 = vadd.f32 1.0, %v1676_v14 }
 0x378   :  { %724 = vrot.lane.b32.xlu1 %v722_v12, %s1806_s25  ;;  %v413_v12 = vadd.f32 %v2158_v20, %v2072_v53 }
 0x379   :  { %1677 = vrcp.f32 %v713_v24 }
 0x37a   :  { %v462_v14 = vadd.f32 %v2101_v15, %v413_v12 }
 0x386   :  { %v1678_v49 = vpop.eup %1677 }
 0x3ea   :  { %v725_v51 = vpop.permute.xlu1 %724 }
 0x3eb   :  { %v727_v17 = vadd.f32 %v725_v51, %v721_v47 }
 0x3ed   :  { %1679 = vtanh.f32 %v727_v17  ;;  %731 = vrot.lane.b32.xlu1 %v727_v17, %s1806_s25 }
 0x3fa   :  { %v1680_v58 = vpop.eup %1679 }
 0x3fb   :  { %v729_v61 = vmul.f32 %v1680_v58, %v1678_v49 }
 0x3fd   :  { %736 = vrot.lane.b32.xlu0 %v729_v61, %s1806_s25 }
 0x45f   :  { %v732_v62 = vpop.permute.xlu1 %731 }
 0x460   :  { %734 = vst.msk [vmem:[#allocation4] sm:$0xff] %vm489_vm0, %v732_v62 }
 0x467   :  { %v832_v0 = vld [vmem:[#allocation4] sm:$0xff] }
 0x468   :  { %834 = vrot.lane.b32.xlu0 %v832_v0, %s1806_s25 }
 0x46f   :  { %v737_v3 = vpop.permute.xlu0 %736 }
 0x470   :  { %739 = vst.msk [vmem:[#allocation3] sm:$0xff] %vm489_vm0, %v737_v3 }
 0x477   :  { %v742_v7 = vld [vmem:[#allocation3] sm:$0xff] }
 0x478   :  { %1598 = vmatmul.mubr.msk.f32.vlgmr.msra.gmra.mxu0 %vm489_vm0, %v742_v7 }
 0x479   :  { %995 = vmatpush1.msra.mxu0 %v1912_v22  ;;  %1042 = vmatprep.mubr.f32.mxu0 %v1805_v1 }
 0x47a   :  { %996 = vmatprep.subr.mxu0 %v1918_v23 }
 0x47b   :  { %997 = vmatpush1.msra.mxu0 %v1924_v25 }
 0x47c   :  { %998 = vmatprep.subr.mxu0 %v1931_v26 }
 0x47d   :  { %999 = vmatpush1.msra.mxu0 %v1937_v29 }
 0x47e   :  { %1000 = vmatprep.subr.mxu0 %v1944_v30 }
 0x47f   :  { %1001 = vmatpush1.msra.mxu0 %v1951_v31 }
 0x480   :  { %1002 = vmatprep.subr.mxu0 %v1959_v32 }
 0x481   :  { %1003 = vmatpush1.msra.mxu0 %v1965_v34 }
 0x482   :  { %1004 = vmatprep.subr.mxu0 %v1971_v35 }
 0x483   :  { %1005 = vmatpush1.msra.mxu0 %v1978_v36 }
 0x484   :  { %1006 = vmatprep.subr.mxu0 %v1989_v38 }
 0x485   :  { %1007 = vmatpush1.msra.mxu0 %v1996_v40 }
 0x486   :  { %1008 = vmatprep.subr.mxu0 %v2003_v41 }
 0x487   :  { %1009 = vmatpush1.msra.mxu0 %v2011_v43 }
 0x488   :  { %1226 = vmatprep.subr.mxu0 %v1902_v10 }
 0x4da   :  { %v835_v58 = vpop.permute.xlu0 %834 }
 0x538   :  { %v812_v9 = vpop.f32.mrf.mxu0 }
 0x539   :  { %v817_v11 = vadd.f32 %v812_v9, %v461_v8 }
 0x53a   :  { %v814_v13 = vpop.f32.mrf.mxu0 }
 0x53b   :  { %v1599_v50 = vmul.f32 -1.442695, %v817_v11  ;;  %v818_v16 = vadd.f32 %v814_v13, %v462_v14 }
 0x53d   :  { %1681 = vpow2.f32 %v1599_v50  ;;  %v1600_v18 = vmul.f32 -1.442695, %v818_v16  ;;  %v417_v50 = vadd.f32 %v2160_v21, %v2074_v54 }
 0x53e   :  { %1683 = vtanh.f32 %v818_v16 }
 0x53f   :  { %v463_v12 = vadd.f32 %v2094_v4, %v417_v50 }
 0x54a   :  { %v1682_v24 = vpop.eup %1681 }
 0x54b   :  { %v822_v47 = vadd.f32 1.0, %v1682_v24  ;;  %v1684_v51 = vpop.eup %1683  ;;  %v419_v24 = vadd.f32 %v2162_v27, %v2076_v55 }
 0x54d   :  { %1685 = vrcp.f32 %v822_v47 }
 0x54e   :  { %1687 = vpow2.f32 %v1600_v18 }
 0x55a   :  { %v1686_v17 = vpop.eup %1685 }
 0x55b   :  { %v838_v52 = vmul.f32 %v1686_v17, %v1684_v51  ;;  %v1688_v49 = vpop.eup %1687  ;;  %v837_v62 = vmul.f32 %v1686_v17, %v835_v58  ;;  %v464_v51 = vadd.f32 %v2101_v15, %v419_v24 }
 0x55c   :  { %v829_v61 = vadd.f32 1.0, %v1688_v49 }
 0x55d   :  { %840 = vrot.lane.b32.xlu1 %v838_v52, %s1806_s25 }
 0x55e   :  { %1689 = vrcp.f32 %v829_v61 }
 0x56b   :  { %v1690_v0 = vpop.eup %1689 }
 0x5cf   :  { %v841_v53 = vpop.permute.xlu1 %840 }
 0x5d0   :  { %v843_v20 = vadd.f32 %v841_v53, %v837_v62 }
 0x5d2   :  { %1691 = vtanh.f32 %v843_v20  ;;  %847 = vrot.lane.b32.xlu1 %v843_v20, %s1806_s25 }
 0x5df   :  { %v1692_v3 = vpop.eup %1691 }
 0x5e0   :  { %v845_v7 = vmul.f32 %v1692_v3, %v1690_v0 }
 0x5e2   :  { %852 = vrot.lane.b32.xlu0 %v845_v7, %s1806_s25 }
 0x644   :  { %v848_v42 = vpop.permute.xlu1 %847 }
 0x645   :  { %850 = vst.msk [vmem:[#allocation4] sm:$0xff] %vm489_vm0, %v848_v42 }
 0x64c   :  { %v948_v8 = vld [vmem:[#allocation4] sm:$0xff] }
 0x64d   :  { %950 = vrot.lane.b32.xlu0 %v948_v8, %s1806_s25 }
 0x654   :  { %v853_v9 = vpop.permute.xlu0 %852 }
 0x655   :  { %855 = vst.msk [vmem:[#allocation3] sm:$0xff] %vm489_vm0, %v853_v9 }
 0x65c   :  { %v858_v11 = vld [vmem:[#allocation3] sm:$0xff] }
 0x65d   :  { %1601 = vmatmul.mubr.msk.f32.vlgmr.msra.gmra.mxu1 %vm489_vm0, %v858_v11  ;;  %v423_v11 = vadd.f32 %v2164_v28, %v2078_v56 }
 0x65e   :  { %1111 = vmatpush1.msra.mxu1 %v1912_v22  ;;  %1158 = vmatprep.mubr.f32.mxu1 %v1805_v1 }
 0x65f   :  { %1112 = vmatprep.subr.mxu1 %v1918_v23  ;;  %v465_v50 = vadd.f32 %v2094_v4, %v423_v11 }
 0x660   :  { %1113 = vmatpush1.msra.mxu1 %v1924_v25 }
 0x661   :  { %1114 = vmatprep.subr.mxu1 %v1931_v26 }
 0x662   :  { %1115 = vmatpush1.msra.mxu1 %v1937_v29 }
 0x663   :  { %1116 = vmatprep.subr.mxu1 %v1944_v30 }
 0x664   :  { %1117 = vmatpush1.msra.mxu1 %v1951_v31 }
 0x665   :  { %1118 = vmatprep.subr.mxu1 %v1959_v32 }
 0x666   :  { %1119 = vmatpush1.msra.mxu1 %v1965_v34 }
 0x667   :  { %1120 = vmatprep.subr.mxu1 %v1971_v35 }
 0x668   :  { %1121 = vmatpush1.msra.mxu1 %v1978_v36 }
 0x669   :  { %1122 = vmatprep.subr.mxu1 %v1989_v38 }
 0x66a   :  { %1123 = vmatpush1.msra.mxu1 %v1996_v40 }
 0x66b   :  { %1124 = vmatprep.subr.mxu1 %v2003_v41 }
 0x66c   :  { %1125 = vmatpush1.msra.mxu1 %v2011_v43 }
 0x66d   :  { %1342 = vmatprep.subr.mxu1 %v1902_v10 }
 0x6bf   :  { %v951_v61 = vpop.permute.xlu0 %950 }
 0x71d   :  { %v928_v13 = vpop.f32.mrf.mxu1 }
 0x71e   :  { %v933_v14 = vadd.f32 %v928_v13, %v463_v12 }
 0x71f   :  { %v930_v47 = vpop.f32.mrf.mxu1 }
 0x720   :  { %v1602_v16 = vmul.f32 -1.442695, %v933_v14  ;;  %v934_v17 = vadd.f32 %v930_v47, %v464_v51 }
 0x722   :  { %1693 = vpow2.f32 %v1602_v16  ;;  %v1603_v21 = vmul.f32 -1.442695, %v934_v17  ;;  %v425_v16 = vadd.f32 %v2166_v33, %v2080_v57 }
 0x723   :  { %1695 = vtanh.f32 %v934_v17 }
 0x724   :  { %v466_v47 = vadd.f32 %v2101_v15, %v425_v16 }
 0x72f   :  { %v1694_v52 = vpop.eup %1693 }
 0x730   :  { %v938_v18 = vadd.f32 1.0, %v1694_v52  ;;  %v1696_v10 = vpop.eup %1695 }
 0x732   :  { %1697 = vrcp.f32 %v938_v18 }
 0x733   :  { %1699 = vpow2.f32 %v1603_v21 }
 0x73f   :  { %v1698_v49 = vpop.eup %1697 }
 0x740   :  { %v954_v54 = vmul.f32 %v1698_v49, %v1696_v10  ;;  %v1700_v58 = vpop.eup %1699  ;;  %v953_v53 = vmul.f32 %v1698_v49, %v951_v61 }
 0x741   :  { %v945_v62 = vadd.f32 1.0, %v1700_v58 }
 0x742   :  { %956 = vrot.lane.b32.xlu1 %v954_v54, %s1806_s25 }
 0x743   :  { %1701 = vrcp.f32 %v945_v62 }
 0x750   :  { %v1702_v20 = vpop.eup %1701 }
 0x7b4   :  { %v957_v55 = vpop.permute.xlu1 %956 }
 0x7b5   :  { %v959_v27 = vadd.f32 %v957_v55, %v953_v53 }
 0x7b7   :  { %1703 = vtanh.f32 %v959_v27  ;;  %963 = vrot.lane.b32.xlu1 %v959_v27, %s1806_s25 }
 0x7c4   :  { %v1704_v0 = vpop.eup %1703 }
 0x7c5   :  { %v961_v3 = vmul.f32 %v1704_v0, %v1702_v20 }
 0x7c7   :  { %968 = vrot.lane.b32.xlu0 %v961_v3, %s1806_s25 }
 0x829   :  { %v964_v7 = vpop.permute.xlu1 %963 }
 0x82a   :  { %966 = vst.msk [vmem:[#allocation4] sm:$0xff] %vm489_vm0, %v964_v7 }
 0x831   :  { %v1064_v42 = vld [vmem:[#allocation4] sm:$0xff] }
 0x832   :  { %1066 = vrot.lane.b32.xlu0 %v1064_v42, %s1806_s25 }
 0x839   :  { %v969_v8 = vpop.permute.xlu0 %968 }
 0x83a   :  { %971 = vst.msk [vmem:[#allocation3] sm:$0xff] %vm489_vm0, %v969_v8 }
 0x841   :  { %v974_v9 = vld [vmem:[#allocation3] sm:$0xff] }
 0x842   :  { %1604 = vmatmul.mubr.msk.f32.vlgmr.msra.gmra.mxu0 %vm489_vm0, %v974_v9 }
 0x843   :  { %1227 = vmatpush1.msra.mxu0 %v1912_v22  ;;  %1274 = vmatprep.mubr.f32.mxu0 %v1805_v1 }
 0x844   :  { %1228 = vmatprep.subr.mxu0 %v1918_v23 }
 0x845   :  { %1229 = vmatpush1.msra.mxu0 %v1924_v25 }
 0x846   :  { %1230 = vmatprep.subr.mxu0 %v1931_v26 }
 0x847   :  { %1231 = vmatpush1.msra.mxu0 %v1937_v29 }
 0x848   :  { %1232 = vmatprep.subr.mxu0 %v1944_v30 }
 0x849   :  { %1233 = vmatpush1.msra.mxu0 %v1951_v31 }
 0x84a   :  { %1234 = vmatprep.subr.mxu0 %v1959_v32 }
 0x84b   :  { %1235 = vmatpush1.msra.mxu0 %v1965_v34 }
 0x84c   :  { %1236 = vmatprep.subr.mxu0 %v1971_v35 }
 0x84d   :  { %1237 = vmatpush1.msra.mxu0 %v1978_v36 }
 0x84e   :  { %1238 = vmatprep.subr.mxu0 %v1989_v38 }
 0x84f   :  { %1239 = vmatpush1.msra.mxu0 %v1996_v40 }
 0x850   :  { %1240 = vmatprep.subr.mxu0 %v2003_v41 }
 0x851   :  { %1241 = vmatpush1.msra.mxu0 %v2011_v43 }
 0x852   :  { %1627 = vmatprep.subr.mxu0 %v1805_v1 }
 0x8a4   :  { %v1067_v54 = vpop.permute.xlu0 %1066 }
 0x902   :  { %v1044_v12 = vpop.f32.mrf.mxu0 }
 0x903   :  { %v1049_v13 = vadd.f32 %v1044_v12, %v465_v50 }
 0x904   :  { %v1046_v24 = vpop.f32.mrf.mxu0 }
 0x905   :  { %v1605_v14 = vmul.f32 -1.442695, %v1049_v13  ;;  %v1050_v51 = vadd.f32 %v1046_v24, %v466_v47 }
 0x907   :  { %1705 = vpow2.f32 %v1605_v14  ;;  %v1606_v28 = vmul.f32 -1.442695, %v1050_v51  ;;  %v435_v14 = vadd.f32 %v2172_v44, %v2087_v63 }
 0x908   :  { %1707 = vtanh.f32 %v1050_v51 }
 0x909   :  { %v469_v16 = vadd.f32 %v2094_v4, %v435_v14 }
 0x914   :  { %v1706_v17 = vpop.eup %1705 }
 0x915   :  { %v1054_v52 = vadd.f32 1.0, %v1706_v17  ;;  %v1708_v18 = vpop.eup %1707  ;;  %v437_v17 = vadd.f32 %v2174_v45, %v2092_v2 }
 0x917   :  { %1709 = vrcp.f32 %v1054_v52 }
 0x918   :  { %1711 = vpow2.f32 %v1606_v28 }
 0x924   :  { %v1710_v10 = vpop.eup %1709 }
 0x925   :  { %v1070_v56 = vmul.f32 %v1710_v10, %v1708_v18  ;;  %v1712_v49 = vpop.eup %1711  ;;  %v1069_v58 = vmul.f32 %v1710_v10, %v1067_v54  ;;  %v470_v18 = vadd.f32 %v2101_v15, %v437_v17 }
 0x926   :  { %v1061_v21 = vadd.f32 1.0, %v1712_v49 }
 0x927   :  { %1072 = vrot.lane.b32.xlu1 %v1070_v56, %s1806_s25 }
 0x928   :  { %1713 = vrcp.f32 %v1061_v21 }
 0x935   :  { %v1714_v61 = vpop.eup %1713 }
 0x999   :  { %v1073_v57 = vpop.permute.xlu1 %1072 }
 0x99a   :  { %v1075_v33 = vadd.f32 %v1073_v57, %v1069_v58 }
 0x99c   :  { %1715 = vtanh.f32 %v1075_v33  ;;  %1079 = vrot.lane.b32.xlu1 %v1075_v33, %s1806_s25 }
 0x9a9   :  { %v1716_v62 = vpop.eup %1715 }
 0x9aa   :  { %v1077_v53 = vmul.f32 %v1716_v62, %v1714_v61 }
 0x9ac   :  { %1084 = vrot.lane.b32.xlu0 %v1077_v53, %s1806_s25 }
 0xa0e   :  { %v1080_v55 = vpop.permute.xlu1 %1079 }
 0xa0f   :  { %1082 = vst.msk [vmem:[#allocation4] sm:$0xff] %vm489_vm0, %v1080_v55 }
 0xa16   :  { %v1180_v27 = vld [vmem:[#allocation4] sm:$0xff] }
 0xa17   :  { %1182 = vrot.lane.b32.xlu0 %v1180_v27, %s1806_s25 }
 0xa1e   :  { %v1085_v20 = vpop.permute.xlu0 %1084 }
 0xa1f   :  { %1087 = vst.msk [vmem:[#allocation3] sm:$0xff] %vm489_vm0, %v1085_v20 }
 0xa26   :  { %v1090_v0 = vld [vmem:[#allocation3] sm:$0xff] }
 0xa27   :  { %1607 = vmatmul.mubr.msk.f32.vlgmr.msra.gmra.mxu1 %vm489_vm0, %v1090_v0 }
 0xa28   :  { %1343 = vmatpush1.msra.mxu1 %v1912_v22  ;;  %1390 = vmatprep.mubr.f32.mxu1 %v1805_v1  ;;  %v429_v22 = vadd.f32 %v2168_v37, %v2083_v59 }
 0xa29   :  { %1344 = vmatprep.subr.mxu1 %v1918_v23 }
 0xa2a   :  { %1345 = vmatpush1.msra.mxu1 %v1924_v25  ;;  %v467_v23 = vadd.f32 %v2094_v4, %v429_v22  ;;  %v441_v22 = vadd.f32 %v2176_v46, %v2096_v5 }
 0xa2b   :  { %1346 = vmatprep.subr.mxu1 %v1931_v26 }
 0xa2c   :  { %1347 = vmatpush1.msra.mxu1 %v1937_v29 }
 0xa2d   :  { %1348 = vmatprep.subr.mxu1 %v1944_v30  ;;  %v431_v30 = vadd.f32 %v2170_v39, %v2085_v60 }
 0xa2e   :  { %1349 = vmatpush1.msra.mxu1 %v1951_v31 }
 0xa2f   :  { %1350 = vmatprep.subr.mxu1 %v1959_v32  ;;  %v468_v32 = vadd.f32 %v2101_v15, %v431_v30  ;;  %v443_v30 = vadd.f32 %v2179_v48, %v2098_v6 }
 0xa30   :  { %1351 = vmatpush1.msra.mxu1 %v1965_v34 }
 0xa31   :  { %1352 = vmatprep.subr.mxu1 %v1971_v35 }
 0xa32   :  { %1353 = vmatpush1.msra.mxu1 %v1978_v36 }
 0xa33   :  { %1354 = vmatprep.subr.mxu1 %v1989_v38 }
 0xa34   :  { %1355 = vmatpush1.msra.mxu1 %v1996_v40 }
 0xa35   :  { %1356 = vmatprep.subr.mxu1 %v2003_v41 }
 0xa36   :  { %1357 = vmatpush1.msra.mxu1 %v2011_v43 }
 0xa89   :  { %v1183_v37 = vpop.permute.xlu0 %1182 }
 0xae7   :  { %v1160_v25 = vpop.f32.mrf.mxu1 }
 0xae8   :  { %v1165_v26 = vadd.f32 %v1160_v25, %v467_v23  ;;  %v471_v23 = vadd.f32 %v2094_v4, %v441_v22 }
 0xae9   :  { %v1162_v31 = vpop.f32.mrf.mxu1 }
 0xaea   :  { %v1608_v29 = vmul.f32 -1.442695, %v1165_v26  ;;  %v1166_v34 = vadd.f32 %v1162_v31, %v468_v32  ;;  %v472_v32 = vadd.f32 %v2101_v15, %v443_v30  ;;  %v1446_v15 = vld [vmem:[%s2380_s5 + $0x38] sm:$0xff] }
 0xaec   :  { %1717 = vpow2.f32 %v1608_v29  ;;  %v1609_v43 = vmul.f32 -1.442695, %v1166_v34 }
 0xaed   :  { %1719 = vtanh.f32 %v1166_v34 }
 0xaf9   :  { %v1718_v35 = vpop.eup %1717 }
 0xafa   :  { %v1170_v36 = vadd.f32 1.0, %v1718_v35  ;;  %v1720_v38 = vpop.eup %1719 }
 0xafc   :  { %1721 = vrcp.f32 %v1170_v36 }
 0xafd   :  { %1723 = vpow2.f32 %v1609_v43 }
 0xb09   :  { %v1722_v40 = vpop.eup %1721 }
 0xb0a   :  { %v1186_v41 = vmul.f32 %v1722_v40, %v1720_v38  ;;  %v1724_v59 = vpop.eup %1723  ;;  %v1185_v7 = vmul.f32 %v1722_v40, %v1183_v37  ;;  %v1445_v37 = vld [vmem:[%s2380_s5 + $0x30] sm:$0xff] }
 0xb0b   :  { %v1177_v3 = vadd.f32 1.0, %v1724_v59 }
 0xb0c   :  { %1188 = vrot.lane.b32.xlu1 %v1186_v41, %s1806_s25 }
 0xb0d   :  { %1725 = vrcp.f32 %v1177_v3  ;;  %v1444_v3 = vld [vmem:[%s2380_s5 + $0x28] sm:$0xff] }
 0xb1a   :  { %v1726_v42 = vpop.eup %1725 }
 0xb7e   :  { %v1189_v60 = vpop.permute.xlu1 %1188 }
 0xb7f   :  { %v1191_v39 = vadd.f32 %v1189_v60, %v1185_v7  ;;  %v1443_v7 = vld [vmem:[%s2380_s5 + $0x20] sm:$0xff]  ;;  %v1442_v60 = vld [vmem:[%s2380_s5 + $0x18] sm:$0xff] }
 0xb81   :  { %1727 = vtanh.f32 %v1191_v39  ;;  %1195 = vrot.lane.b32.xlu1 %v1191_v39, %s1806_s25 }
 0xb8e   :  { %v1728_v8 = vpop.eup %1727 }
 0xb8f   :  { %v1193_v9 = vmul.f32 %v1728_v8, %v1726_v42  ;;  %v1441_v42 = vld [vmem:[%s2380_s5 + $0x10] sm:$0xff] }
 0xb91   :  { %1200 = vrot.lane.b32.xlu0 %v1193_v9, %s1806_s25 }
 0xbf3   :  { %v1196_v11 = vpop.permute.xlu1 %1195 }
 0xbf4   :  { %1198 = vst.msk [vmem:[#allocation4] sm:$0xff] %vm489_vm0, %v1196_v11  ;;  %v1440_v11 = vld [vmem:[%s2380_s5 + $0x8] sm:$0xff] }
 0xbfb   :  { %v1296_v50 = vld [vmem:[#allocation4] sm:$0xff] }
 0xbfc   :  { %1298 = vrot.lane.b32.xlu0 %v1296_v50, %s1806_s25  ;;  %v1439_v50 = vld [vmem:[%s2380_s5] sm:$0xff]  ;;  %s1809_s5 = smov [#allocation9]  }
 0xbfd   :  { %s1551_s15 = sshll.u32 %s1809_s5, 4  ;;  %s1552_s15 = int_to_ptr.vmem [resolvable:$true] %s1551_s15 }
 0xbfe   :  { %p1782_p6 = scmp.lt.s32.totalorder %s1552_s15, %s1552_s15 }
 0xc03   :  { %v1201_v12 = vpop.permute.xlu0 %1200 }
 0xc04   :  { %1203 = vst.msk [vmem:[#allocation3] sm:$0xff] %vm489_vm0, %v1201_v12 }
 0xc0b   :  { %v1206_v13 = vld [vmem:[#allocation3] sm:$0xff] }
 0xc0c   :  { %1610 = vmatmul.mubr.msk.f32.vlgmr.msra.gmra.mxu0 %vm489_vm0, %v1206_v13 }
 0xc0d   :  { %1628 = vmatpush3.msra.mxu0 %v1446_v15  ;;  %1643 = vmatprep.mubr.msk.f32.mxu0 %vm1808_vm2, %v1805_v1 }
 0xc0e   :  { %1629 = vmatprep.subr.mxu0 %v1805_v1 }
 0xc0f   :  { %1630 = vmatpush3.msra.mxu0 %v1445_v37 }
 0xc10   :  { %1631 = vmatprep.subr.mxu0 %v1805_v1 }
 0xc11   :  { %1632 = vmatpush3.msra.mxu0 %v1444_v3 }
 0xc12   :  { %1633 = vmatprep.subr.mxu0 %v1805_v1 }
 0xc13   :  { %1634 = vmatpush3.msra.mxu0 %v1443_v7 }
 0xc14   :  { %1635 = vmatprep.subr.mxu0 %v1805_v1 }
 0xc15   :  { %1636 = vmatpush3.msra.mxu0 %v1442_v60 }
 0xc16   :  { %1637 = vmatprep.subr.mxu0 %v1805_v1 }
 0xc17   :  { %1638 = vmatpush3.msra.mxu0 %v1441_v42 }
 0xc18   :  { %1639 = vmatprep.subr.mxu0 %v1805_v1 }
 0xc19   :  { %1640 = vmatpush3.msra.mxu0 %v1440_v11 }
 0xc1a   :  { %1641 = vmatprep.subr.mxu0 %v1805_v1 }
 0xc1b   :  { %1642 = vmatpush3.msra.mxu0 %v1439_v50 }
 0xc6e   :  { %v1299_v58 = vpop.permute.xlu0 %1298 }
 0xccc   :  { %v1276_v24 = vpop.f32.mrf.mxu0 }
 0xccd   :  { %v1281_v47 = vadd.f32 %v1276_v24, %v469_v16  ;;  %v1616_v24 = vld [vmem:[%s2381_s6] ss:$0 sm:$0xff]  ;;  %s1777_s6 = scalar_lea.vmem %s1552_s15, 128 }
 0xcce   :  { %v1278_v52 = vpop.f32.mrf.mxu0  ;;  %p1778_p5 = scmp.ne.s32.totalorder %s1552_s15, %s1777_s6  ;;  %p1783_p7 = scmp.lt.s32.totalorder %s1777_s6, %s1777_s6 }
 0xccf   :  { %v1611_v51 = vmul.f32 -1.442695, %v1281_v47  ;;  %v1282_v10 = vadd.f32 %v1278_v52, %v470_v18 }
 0xcd0   :  { %p1784_p8 = por %p1783_p7, %p1782_p6 }
 0xcd1   :  { %1729 = vpow2.f32 %v1611_v51  ;;  %v1612_v44 = vmul.f32 -1.442695, %v1282_v10 }
 0xcd2   :  { %1731 = vtanh.f32 %v1282_v10  ;;  %p1785_p9 = pnand %p1784_p8, %p1778_p5 }
 0xcde   :  { %v1730_v56 = vpop.eup %1729 }
 0xcdf   :  { %v1286_v28 = vadd.f32 1.0, %v1730_v56  ;;  %v1732_v49 = vpop.eup %1731 }
 0xce1   :  { %1733 = vrcp.f32 %v1286_v28 }
 0xce2   :  { %1735 = vpow2.f32 %v1612_v44 }
 0xcee   :  { %v1734_v54 = vpop.eup %1733 }
 0xcef   :  { %v1302_v63 = vmul.f32 %v1734_v54, %v1732_v49  ;;  %v1736_v21 = vpop.eup %1735  ;;  %v1301_v33 = vmul.f32 %v1734_v54, %v1299_v58 }
 0xcf0   :  { %v1293_v57 = vadd.f32 1.0, %v1736_v21 }
 0xcf1   :  { %1304 = vrot.lane.b32.xlu1 %v1302_v63, %s1806_s25 }
 0xcf2   :  { %1737 = vrcp.f32 %v1293_v57 }
 0xcff   :  { %v1738_v61 = vpop.eup %1737 }
 0xd63   :  { %v1305_v2 = vpop.permute.xlu1 %1304 }
 0xd64   :  { %v1307_v45 = vadd.f32 %v1305_v2, %v1301_v33 }
 0xd66   :  { %1739 = vtanh.f32 %v1307_v45  ;;  %1311 = vrot.lane.b32.xlu1 %v1307_v45, %s1806_s25 }
 0xd73   :  { %v1740_v62 = vpop.eup %1739 }
 0xd74   :  { %v1309_v53 = vmul.f32 %v1740_v62, %v1738_v61 }
 0xd76   :  { %1316 = vrot.lane.b32.xlu0 %v1309_v53, %s1806_s25 }
 0xdd8   :  { %v1312_v55 = vpop.permute.xlu1 %1311 }
 0xdd9   :  { %1314 = vst.msk [vmem:[#allocation4] sm:$0xff] %vm489_vm0, %v1312_v55 }
 0xde0   :  { %v1412_v27 = vld [vmem:[#allocation4] sm:$0xff] }
 0xde1   :  { %1414 = vrot.lane.b32.xlu0 %v1412_v27, %s1806_s25 }
 0xde8   :  { %v1317_v20 = vpop.permute.xlu0 %1316 }
 0xde9   :  { %1319 = vst.msk [vmem:[#allocation3] sm:$0xff] %vm489_vm0, %v1317_v20 }
 0xdf0   :  { %v1322_v0 = vld [vmem:[#allocation3] sm:$0xff] }
 0xdf1   :  { %1613 = vmatmul.mubr.msk.f32.vlgmr.msra.gmra.mxu1 %vm489_vm0, %v1322_v0 }
 0xe53   :  { %v1415_v41 = vpop.permute.xlu0 %1414 }
 0xeb1   :  { %v1392_v25 = vpop.f32.mrf.mxu1 }
 0xeb2   :  { %v1397_v26 = vadd.f32 %v1392_v25, %v471_v23 }
 0xeb3   :  { %v1394_v31 = vpop.f32.mrf.mxu1 }
 0xeb4   :  { %v1614_v29 = vmul.f32 -1.442695, %v1397_v26  ;;  %v1398_v34 = vadd.f32 %v1394_v31, %v472_v32 }
 0xeb6   :  { %1741 = vpow2.f32 %v1614_v29  ;;  %v1615_v4 = vmul.f32 -1.442695, %v1398_v34 }
 0xeb7   :  { %1743 = vtanh.f32 %v1398_v34 }
 0xec3   :  { %v1742_v35 = vpop.eup %1741 }
 0xec4   :  { %v1402_v36 = vadd.f32 1.0, %v1742_v35  ;;  %v1744_v38 = vpop.eup %1743 }
 0xec6   :  { %1745 = vrcp.f32 %v1402_v36 }
 0xec7   :  { %1747 = vpow2.f32 %v1615_v4 }
 0xed3   :  { %v1746_v40 = vpop.eup %1745 }
 0xed4   :  { %v1418_v5 = vmul.f32 %v1746_v40, %v1744_v38  ;;  %v1748_v46 = vpop.eup %1747  ;;  %v1417_v59 = vmul.f32 %v1746_v40, %v1415_v41 }
 0xed5   :  { %v1409_v43 = vadd.f32 1.0, %v1748_v46 }
 0xed6   :  { %1420 = vrot.lane.b32.xlu1 %v1418_v5, %s1806_s25 }
 0xed7   :  { %1749 = vrcp.f32 %v1409_v43 }
 0xee4   :  { %v1750_v39 = vpop.eup %1749 }
 0xf48   :  { %v1421_v6 = vpop.permute.xlu1 %1420 }
 0xf49   :  { %v1423_v48 = vadd.f32 %v1421_v6, %v1417_v59 }
 0xf4b   :  { %1751 = vtanh.f32 %v1423_v48  ;;  %1427 = vrot.lane.b32.xlu1 %v1423_v48, %s1806_s25 }
 0xf58   :  { %v1752_v8 = vpop.eup %1751 }
 0xf59   :  { %v1425_v9 = vmul.f32 %v1752_v8, %v1750_v39 }
 0xf5b   :  { %1432 = vrot.lane.b32.xlu0 %v1425_v9, %s1806_s25 }
 0xfbd   :  { %v1428_v12 = vpop.permute.xlu1 %1427 }
 0xfbe   :  { %1430 = vst.msk [vmem:[#allocation4] sm:$0xff] %vm489_vm0, %v1428_v12 }
 0xfcd   :  { %v1433_v13 = vpop.permute.xlu0 %1432 }
 0xfce   :  { %1435 = vst.msk [vmem:[#allocation3] sm:$0xff] %vm489_vm0, %v1433_v13 }
 0xfd5   :  { %v1436_v14 = vld [vmem:[#allocation3] sm:$0xff] }
 0xfd6   :  { %1437 = vst.msk [vmem:[#allocation5] sm:$0xff] %vm489_vm0, %v1436_v14 }
 0xfdd   :  { %v1438_v16 = vld [vmem:[#allocation5] sm:$0xff] }
 0xfde   :  { %1644 = vmatmul.mubr.msk.f32.vlgmr.msra.gmra.mxu0 %vm489_vm0, %v1438_v16  ;;  %vm1527_vm0 = vcmp.ge.s32.totalorder %v1907_v19, 16 }
0x109e   :  { %v1523_v47 = vpop.f32.mrf.mxu0 }
0x109f   :  { %v1524_v51 = vadd.f32 %v1616_v24, %v1523_v47 }
0x10a0   :  { %v1645_v1 = vpop.f32.mrf.mxu0 }
0x10a1   :  { %v1529_v17 = vmin.f32 %v1524_v51, 20.0  ;;  %vm1528_vm4 = vcmp.gt.f32.partialorder %v1524_v51, 20.0 }
0x10a3   :  { %v1530_v52 = vmul.f32 1.442695, %v1529_v17 }
0x10a5   :  { %1753 = vpow2.f32 %v1530_v52 }
0x10b2   :  { %v1754_v18 = vpop.eup %1753 }
0x10b3   :  { %v1532_v10 = vadd.f32 1.0, %v1754_v18  ;;  %v1535_v56 = vmul.f32 -0.5, %v1754_v18  ;;  %v1538_v49 = vand.u32 2147483647, %v1754_v18 }
0x10b5   :  { %1755 = vlog2.f32 %v1532_v10  ;;  %v1536_v28 = vadd.f32 1.0, %v1535_v56  ;;  %vm1539_vm3 = vcmp.lt.f32.partialorder %v1538_v49, 0.0004427343 }
0x10b7   :  { %v1537_v44 = vmul.f32 %v1754_v18, %v1536_v28 }
0x10c2   :  { %v1756_v54 = vpop.eup %1755 }
0x10c3   :  { %v1534_v63 = vmul.f32 0.6931472, %v1756_v54 }
0x10c5   :  { %v1540_v21 = vsel %vm1539_vm3, %v1537_v44, %v1534_v63 }
0x10c6   :  { %v1541_v58 = vsel %vm1528_vm4, %v1524_v51, %v1540_v21 }
0x10c7   :  { %v1542_v57 = vsel %vm1527_vm0, %v1541_v58, %v1524_v51 }
0x10c8   :  { %1544 = vst.msk [vmem:[#allocation9] sm:$0xff] %vm1543_vm5, %v1542_v57 }
0x10c9   :  { %1788 = shalt.err (!%p1785_p9)
}
0x10ca   :  { %1554 = dma.vmem_to_hbm [thread:$0]  %s1552_s15, 128, %s2382_s7, [#allocation8]  }
0x10cb   :  { %1799 = dma.done.wait [#allocation8], 128  }
0x10cc   :  { %1800 = vsyncadd [#allocation8], 4294967168 }
0x10cd   :  { %1558 = vsyncpa [#allocation7], 1 }
0x10ce   :  { %1559 = vsyncpa [#allocation8], 1 }

</bundles_post_ra>
